<compile_context>
chip_gen: v7x
topology: tpu7x:2x2x1
jax: 0.10.0
libtpu: 0.0.40
codegen_flags: <defaults>
</compile_context>

<pallas_src>
import functools
import math

import jax
import jax.numpy as jnp
from jax import lax
from jax.experimental import pallas as pl
from jax.experimental.pallas import tpu as pltpu


# --------------------------------------------------------------------------
# In-kernel helpers (pure jnp on loaded values, all f32)
# --------------------------------------------------------------------------

def _layernorm(x, g, b, eps=1e-5):
    """LayerNorm over last dim, eps=1e-5 (PyTorch default), biased variance."""
    mean = jnp.mean(x, axis=-1, keepdims=True)
    var = jnp.mean((x - mean) ** 2, axis=-1, keepdims=True)
    return (x - mean) * lax.rsqrt(var + eps) * g + b


def _gelu_exact(x):
    """Exact (erf) GELU, matching torch.nn.functional.gelu default."""
    return 0.5 * x * (1.0 + lax.erf(x * (1.0 / math.sqrt(2.0))))


def _elu_plus_one(x):
    """phi(x) = elu(x) + 1; keep as a select (not mask*exp) so exp(big) inf is never multiplied."""
    return jnp.where(x > 0, x + 1.0, jnp.exp(x))


# --------------------------------------------------------------------------
# Fused whole-decoder kernel
#   grid = (batch, layer); batch axis "parallel" (megacore), layer axis "arbitrary".
#   The residual stream x lives in out_ref (constant output block index across layers).
# --------------------------------------------------------------------------

def _decoder_kernel(mem_ref, tgt_ref,
                    wqkv_ref, bqkv_ref, wso_ref, bso_ref,
                    wc_ref, bc_ref,
                    wff1_ref, bff1_ref, wff2_ref, bff2_ref,
                    lng_ref, lnb_ref, lnfg_ref, lnfb_ref,
                    out_ref, *, H, Dh, eps_attn):
    D = H * Dh
    layer = pl.program_id(1)
    n_layers = pl.num_programs(1)
    mxu_dt = wqkv_ref.dtype                                # bf16 MXU operand dtype

    @pl.when(layer == 0)
    def _():
        out_ref[0] = tgt_ref[0]                            # initialize residual stream

    x = out_ref[0]                                         # (L, D) f32, resident across layers
    L = x.shape[0]
    ln_g = lng_ref[0]                                      # (3, D)
    ln_b = lnb_ref[0]

    # Per-sequence causal mask generated in-kernel (no HBM mask, no cross-sequence waste).
    row = lax.broadcasted_iota(jnp.int32, (L, L), 0)
    col = lax.broadcasted_iota(jnp.int32, (L, L), 1)
    causal = col <= row

    # ---- causal linear self-attention (fused QKV projection, bf16 MXU / f32 accumulate) ------
    qkv = jnp.dot(x.astype(mxu_dt), wqkv_ref[0],
                  preferred_element_type=jnp.float32) + bqkv_ref[0]            # (L, 3D) f32
    q = qkv[:, :D]
    k = qkv[:, D:2 * D]
    v = qkv[:, 2 * D:]
    phi_q = _elu_plus_one(q)                               # f32 elementwise
    phi_k = _elu_plus_one(k)

    head_outs = []
    for h in range(H):                                     # static unrolled head loop
        lo = h * Dh
        hi = lo + Dh
        pq = phi_q[:, lo:hi].astype(mxu_dt)                # (L, Dh)
        pk = phi_k[:, lo:hi].astype(mxu_dt)
        vh = v[:, lo:hi].astype(mxu_dt)
        # scores: contraction on last axis of both operands (no explicit transpose copy)
        a = lax.dot_general(pq, pk, (((1,), (1,)), ((), ())),
                            preferred_element_type=jnp.float32)                # (L, L) f32
        a = jnp.where(causal, a, 0.0)                      # select, not arithmetic masking
        num = jnp.dot(a.astype(mxu_dt), vh, preferred_element_type=jnp.float32)  # (L, Dh)
        den = jnp.sum(a, axis=-1, keepdims=True) + eps_attn                     # (L, 1)
        head_outs.append(num / den)
    sa = jnp.concatenate(head_outs, axis=-1)               # (L, D): all heads merged once
    sa = jnp.dot(sa.astype(mxu_dt), wso_ref[0],            # single K=D out-projection matmul
                 preferred_element_type=jnp.float32) + bso_ref[0]
    x = _layernorm(x + sa, ln_g[0:1], ln_b[0:1])

    # ---- diagonal cross attention: identity over memory positions ----------------------------
    # TODO(synk): BFT's 'diagonal' inner attention source is not vendored here; implemented as
    # A = I (query i attends only memory position i) => value passthrough; value+out projections
    # are pre-folded into (W_c, b_c) on the host (exact affine composition).
    cross = jnp.dot(mem_ref[0].astype(mxu_dt), wc_ref[0],
                    preferred_element_type=jnp.float32) + bc_ref[0]
    x = _layernorm(x + cross, ln_g[1:2], ln_b[1:2])

    # ---- feed forward (gelu) ------------------------------------------------------------------
    h1 = jnp.dot(x.astype(mxu_dt), wff1_ref[0],
                 preferred_element_type=jnp.float32) + bff1_ref[0]
    h1 = _gelu_exact(h1)                                   # f32 elementwise
    h2 = jnp.dot(h1.astype(mxu_dt), wff2_ref[0],
                 preferred_element_type=jnp.float32) + bff2_ref[0]
    x = _layernorm(x + h2, ln_g[2:3], ln_b[2:3])

    # carry x in the resident output block; final LayerNorm only on the last layer
    @pl.when(layer < n_layers - 1)
    def _():
        out_ref[0] = x

    @pl.when(layer == n_layers - 1)
    def _():
        out_ref[0] = _layernorm(x, lnfg_ref[...], lnfb_ref[...])


# --------------------------------------------------------------------------
# Parameter init (deterministic, synthetic — no checkpoint load)
# --------------------------------------------------------------------------

def _lin_init(key, fan_in, fan_out):
    k1, k2 = jax.random.split(key)
    bound = 1.0 / jnp.sqrt(jnp.float32(fan_in))
    w = jax.random.uniform(k1, (fan_in, fan_out), jnp.float32, -bound, bound)
    b = jax.random.uniform(k2, (fan_out,), jnp.float32, -bound, bound)
    return {"w": w, "b": b}


def _ln_init(d):
    return {"g": jnp.ones((d,), jnp.float32), "b": jnp.zeros((d,), jnp.float32)}


def init_params(key, d_model, n_heads, n_layers, dim_feedforward):
    layers = []
    for _ in range(n_layers):
        keys = jax.random.split(key, 9)
        key = keys[0]
        layers.append({
            "sa_q": _lin_init(keys[1], d_model, d_model),
            "sa_k": _lin_init(keys[2], d_model, d_model),
            "sa_v": _lin_init(keys[3], d_model, d_model),
            "sa_o": _lin_init(keys[4], d_model, d_model),
            # diagonal cross attention: only value/out projections affect the output
            "ca_v": _lin_init(keys[5], d_model, d_model),
            "ca_o": _lin_init(keys[6], d_model, d_model),
            "ff1": _lin_init(keys[7], d_model, dim_feedforward),
            "ff2": _lin_init(keys[8], dim_feedforward, d_model),
            "ln1": _ln_init(d_model),
            "ln2": _ln_init(d_model),
            "ln3": _ln_init(d_model),
        })
    return {"layers": layers, "ln_f": _ln_init(d_model)}


def _prepare_weights(params):
    """Stack per-layer weights along a leading layer axis; fuse QKV; fold cross-attention.

    Weight matrices are stored bf16 (MXU-native, halves DMA + VMEM); biases / LN params stay f32.
    """
    lps = params["layers"]
    wdt = jnp.bfloat16

    def stack(fn):
        return jnp.stack([fn(lp) for lp in lps], axis=0)

    w_qkv = stack(lambda lp: jnp.concatenate(
        [lp["sa_q"]["w"], lp["sa_k"]["w"], lp["sa_v"]["w"]], axis=1)).astype(wdt)   # (nl, D, 3D)
    b_qkv = stack(lambda lp: jnp.concatenate(
        [lp["sa_q"]["b"], lp["sa_k"]["b"], lp["sa_v"]["b"]], axis=0))[:, None, :]
    w_so = stack(lambda lp: lp["sa_o"]["w"]).astype(wdt)                            # (nl, D, D)
    b_so = stack(lambda lp: lp["sa_o"]["b"])[:, None, :]
    # identity-diagonal cross attention, exact affine fold: (m@Wv+bv)@Wo+bo = m@(WvWo) + (bvWo+bo)
    w_c = stack(lambda lp: lp["ca_v"]["w"] @ lp["ca_o"]["w"]).astype(wdt)
    b_c = stack(lambda lp: lp["ca_v"]["b"] @ lp["ca_o"]["w"] + lp["ca_o"]["b"])[:, None, :]
    w_ff1 = stack(lambda lp: lp["ff1"]["w"]).astype(wdt)
    b_ff1 = stack(lambda lp: lp["ff1"]["b"])[:, None, :]
    w_ff2 = stack(lambda lp: lp["ff2"]["w"]).astype(wdt)
    b_ff2 = stack(lambda lp: lp["ff2"]["b"])[:, None, :]
    ln_g = stack(lambda lp: jnp.stack([lp["ln1"]["g"], lp["ln2"]["g"], lp["ln3"]["g"]], 0))
    ln_b = stack(lambda lp: jnp.stack([lp["ln1"]["b"], lp["ln2"]["b"], lp["ln3"]["b"]], 0))
    lnf_g = params["ln_f"]["g"][None, :]
    lnf_b = params["ln_f"]["b"][None, :]
    return dict(w_qkv=w_qkv, b_qkv=b_qkv, w_so=w_so, b_so=b_so, w_c=w_c, b_c=b_c,
                w_ff1=w_ff1, b_ff1=b_ff1, w_ff2=w_ff2, b_ff2=b_ff2,
                ln_g=ln_g, ln_b=ln_b, lnf_g=lnf_g, lnf_b=lnf_b)


def _vmem_limit_bytes(L, D, F):
    """Explicit VMEM budget: resident tiles + double-buffered bf16 per-layer weight set + temps."""
    weights = (D * 3 * D + 2 * D * D + 2 * D * F) * 2          # bf16 matrices, one layer
    scalars = (3 * D + 8 * D + F) * 4                          # biases + LN params, f32
    act_tiles = 3 * 2 * L * D * 4                              # memory / target / out tiles
    temps = (L * 3 * D + L * F + 2 * L * L + 8 * L * D) * 4    # qkv, ffn hidden, scores, misc
    est = 2 * (weights + scalars) + act_tiles + temps + (4 << 20)
    return int(min(max(est, 32 << 20), 64 << 20))              # 64 MiB cap fits every generation


# --------------------------------------------------------------------------
# Decoder forward (single pallas_call)
# --------------------------------------------------------------------------

def decoder_forward(params, memory, target, n_heads):
    B, L, D = target.shape
    H = n_heads
    Dh = D // H

    w = _prepare_weights(params)
    n_layers = w["w_qkv"].shape[0]
    F = w["w_ff1"].shape[-1]

    mem = memory.astype(jnp.float32)
    tgt = target.astype(jnp.float32)

    batch_map = lambda b, l: (b, 0, 0)          # varies with batch, constant across layers
    layer_map = lambda b, l: (l, 0, 0)          # per-layer weight slabs

    def lspec(*shape):
        return pl.BlockSpec((1,) + shape, layer_map)

    out = pl.pallas_call(
        functools.partial(_decoder_kernel, H=H, Dh=Dh, eps_attn=1e-6),
        out_shape=jax.ShapeDtypeStruct((B, L, D), jnp.float32),
        grid=(B, n_layers),
        in_specs=[
            pl.BlockSpec((1, L, D), batch_map),     # memory (per-sequence tile)
            pl.BlockSpec((1, L, D), batch_map),     # target (read only at layer 0)
            lspec(D, 3 * D),                        # w_qkv (bf16)
            lspec(1, 3 * D),                        # b_qkv
            lspec(D, D),                            # w_so  (bf16)
            lspec(1, D),                            # b_so
            lspec(D, D),                            # w_c   (bf16, folded cross attention)
            lspec(1, D),                            # b_c
            lspec(D, F),                            # w_ff1 (bf16)
            lspec(1, F),                            # b_ff1
            lspec(F, D),                            # w_ff2 (bf16)
            lspec(1, D),                            # b_ff2
            lspec(3, D),                            # ln gains  (ln1, ln2, ln3)
            lspec(3, D),                            # ln biases
            pl.BlockSpec((1, D), lambda b, l: (0, 0)),   # final LN gain
            pl.BlockSpec((1, D), lambda b, l: (0, 0)),   # final LN bias
        ],
        out_specs=pl.BlockSpec((1, L, D), batch_map),    # carries x, resident across layer axis
        compiler_params=pltpu.CompilerParams(
            dimension_semantics=("parallel", "arbitrary"),   # batch across cores, layers serial
            vmem_limit_bytes=_vmem_limit_bytes(L, D, F)),
    )(mem, tgt,
      w["w_qkv"], w["b_qkv"], w["w_so"], w["b_so"], w["w_c"], w["b_c"],
      w["w_ff1"], w["b_ff1"], w["w_ff2"], w["b_ff2"],
      w["ln_g"], w["ln_b"], w["lnf_g"], w["lnf_b"])

    return out


# --------------------------------------------------------------------------

if __name__ == "__main__":
    d_model, n_heads, n_layers, dim_feedforward = 32, 4, 2, 64
    B, L = 2, 8

    key = jax.random.PRNGKey(0)
    kp, km, kt = jax.random.split(key, 3)
    params = init_params(kp, d_model, n_heads, n_layers, dim_feedforward)

    memory = jax.random.normal(km, (B, L, d_model), jnp.float32)
    target = jax.random.normal(kt, (B, L, d_model), jnp.float32)

    fwd = jax.jit(decoder_forward, static_argnums=3)
    out = fwd(params, memory, target, n_heads)
    out = jax.block_until_ready(out)
    assert out.shape == (B, L, d_model) and out.dtype == jnp.float32
    assert bool(jnp.all(jnp.isfinite(out)))
    print("KERNEL_OK")
</pallas_src>

<mosaic_0001>
module attributes {stable_mosaic.version = 11 : i64} {
  func.func @_decoder_kernel(%arg0: i32, %arg1: i32, %arg2: memref<1x8x32xf32, #tpu.memory_space<vmem>>, %arg3: memref<1x8x32xf32, #tpu.memory_space<vmem>>, %arg4: memref<1x32x96xbf16, #tpu.memory_space<vmem>>, %arg5: memref<1x1x96xf32, #tpu.memory_space<vmem>>, %arg6: memref<1x32x32xbf16, #tpu.memory_space<vmem>>, %arg7: memref<1x1x32xf32, #tpu.memory_space<vmem>>, %arg8: memref<1x32x32xbf16, #tpu.memory_space<vmem>>, %arg9: memref<1x1x32xf32, #tpu.memory_space<vmem>>, %arg10: memref<1x32x64xbf16, #tpu.memory_space<vmem>>, %arg11: memref<1x1x64xf32, #tpu.memory_space<vmem>>, %arg12: memref<1x64x32xbf16, #tpu.memory_space<vmem>>, %arg13: memref<1x1x32xf32, #tpu.memory_space<vmem>>, %arg14: memref<1x3x32xf32, #tpu.memory_space<vmem>>, %arg15: memref<1x3x32xf32, #tpu.memory_space<vmem>>, %arg16: memref<1x32xf32, #tpu.memory_space<vmem>>, %arg17: memref<1x32xf32, #tpu.memory_space<vmem>>, %arg18: memref<1x8x32xf32, #tpu.memory_space<vmem>>) attributes {dimension_semantics = [#tpu.dimension_semantics<parallel>, #tpu.dimension_semantics<arbitrary>], iteration_bounds = array<i64: 2, 2>, scalar_prefetch = 0 : i64, scratch_operands = 0 : i64, tpu.core_type = #tpu.core_type<tc>, window_params = [{transform_indices = @transform_0, window_bounds = array<i64: 1, 8, 32>}, {transform_indices = @transform_1, window_bounds = array<i64: 1, 8, 32>}, {transform_indices = @transform_2, window_bounds = array<i64: 1, 32, 96>}, {transform_indices = @transform_3, window_bounds = array<i64: 1, 1, 96>}, {transform_indices = @transform_4, window_bounds = array<i64: 1, 32, 32>}, {transform_indices = @transform_5, window_bounds = array<i64: 1, 1, 32>}, {transform_indices = @transform_6, window_bounds = array<i64: 1, 32, 32>}, {transform_indices = @transform_7, window_bounds = array<i64: 1, 1, 32>}, {transform_indices = @transform_8, window_bounds = array<i64: 1, 32, 64>}, {transform_indices = @transform_9, window_bounds = array<i64: 1, 1, 64>}, {transform_indices = @transform_10, window_bounds = array<i64: 1, 64, 32>}, {transform_indices = @transform_11, window_bounds = array<i64: 1, 1, 32>}, {transform_indices = @transform_12, window_bounds = array<i64: 1, 3, 32>}, {transform_indices = @transform_13, window_bounds = array<i64: 1, 3, 32>}, {pipeline_mode = #tpu.pipeline_mode<synchronous>, transform_indices = @transform_14, window_bounds = array<i64: 1, 32>}, {pipeline_mode = #tpu.pipeline_mode<synchronous>, transform_indices = @transform_15, window_bounds = array<i64: 1, 32>}, {transform_indices = @transform_16, window_bounds = array<i64: 1, 8, 32>}]} {
    %c0_i32 = arith.constant 0 : i32
    %0 = arith.cmpi eq, %arg1, %c0_i32 : i32
    %1 = arith.extui %0 : i1 to i32
    %c0_i32_0 = arith.constant 0 : i32
    %2 = arith.cmpi ne, %1, %c0_i32_0 : i32
    scf.if %2 {
      %c0_91 = arith.constant 0 : index
      %c0_92 = arith.constant 0 : index
      %c0_93 = arith.constant 0 : index
      %227 = vector.load %arg3[%c0_91, %c0_92, %c0_93] : memref<1x8x32xf32, #tpu.memory_space<vmem>>, vector<1x8x32xf32>
      %228 = vector.shape_cast %227 : vector<1x8x32xf32> to vector<8x32xf32>
      %c0_94 = arith.constant 0 : index
      %c0_95 = arith.constant 0 : index
      %c0_96 = arith.constant 0 : index
      %229 = vector.load %arg18[%c0_94, %c0_95, %c0_96] : memref<1x8x32xf32, #tpu.memory_space<vmem>>, vector<1x8x32xf32>
      %230 = vector.shape_cast %229 : vector<1x8x32xf32> to vector<8x32xf32>
      %231 = vector.shape_cast %228 : vector<8x32xf32> to vector<1x8x32xf32>
      tpu.vector_store %arg18[%c0_94, %c0_95, %c0_96], %231 {strides = array<i32>} : memref<1x8x32xf32, #tpu.memory_space<vmem>>, vector<1x8x32xf32>,
    } else {
    }
    %c0 = arith.constant 0 : index
    %c0_1 = arith.constant 0 : index
    %c0_2 = arith.constant 0 : index
    %3 = vector.load %arg18[%c0, %c0_1, %c0_2] : memref<1x8x32xf32, #tpu.memory_space<vmem>>, vector<1x8x32xf32>
    %4 = vector.shape_cast %3 : vector<1x8x32xf32> to vector<8x32xf32>
    %c0_3 = arith.constant 0 : index
    %c0_4 = arith.constant 0 : index
    %c0_5 = arith.constant 0 : index
    %5 = vector.load %arg14[%c0_3, %c0_4, %c0_5] : memref<1x3x32xf32, #tpu.memory_space<vmem>>, vector<1x3x32xf32>
    %6 = vector.shape_cast %5 : vector<1x3x32xf32> to vector<3x32xf32>
    %c0_6 = arith.constant 0 : index
    %c0_7 = arith.constant 0 : index
    %c0_8 = arith.constant 0 : index
    %7 = vector.load %arg15[%c0_6, %c0_7, %c0_8] : memref<1x3x32xf32, #tpu.memory_space<vmem>>, vector<1x3x32xf32>
    %8 = vector.shape_cast %7 : vector<1x3x32xf32> to vector<3x32xf32>
    %9 = tpu.iota {dimensions = array<i32: 0>} : vector<8x8xi32>
    %10 = tpu.iota {dimensions = array<i32: 1>} : vector<8x8xi32>
    %11 = arith.cmpi sle, %10, %9 : vector<8x8xi32>
    %12 = arith.truncf %4 : vector<8x32xf32> to vector<8x32xbf16>
    %c0_9 = arith.constant 0 : index
    %c0_10 = arith.constant 0 : index
    %c0_11 = arith.constant 0 : index
    %13 = vector.load %arg4[%c0_9, %c0_10, %c0_11] : memref<1x32x96xbf16, #tpu.memory_space<vmem>>, vector<1x32x96xbf16>
    %14 = vector.shape_cast %13 : vector<1x32x96xbf16> to vector<32x96xbf16>
    %cst = arith.constant dense<0.000000e+00> : vector<8x96xf32>
    %15 = tpu.matmul %12, %14, %cst {dimension_numbers = #tpu.dot_dimension_numbers<[1], [0], [0], [1], [0, 0, 1, 1], [], []>} : vector<8x32xbf16>, vector<32x96xbf16>, vector<8x96xf32> -> vector<8x96xf32>
    %c0_12 = arith.constant 0 : index
    %c0_13 = arith.constant 0 : index
    %c0_14 = arith.constant 0 : index
    %16 = vector.load %arg5[%c0_12, %c0_13, %c0_14] : memref<1x1x96xf32, #tpu.memory_space<vmem>>, vector<1x1x96xf32>
    %17 = vector.shape_cast %16 : vector<1x1x96xf32> to vector<1x96xf32>
    %18 = vector.broadcast %17 : vector<1x96xf32> to vector<8x96xf32>
    %19 = arith.addf %15, %18 : vector<8x96xf32>
    %20 = vector.extract_strided_slice %19 {offsets = [0, 0], sizes = [8, 32], strides = [1, 1]} : vector<8x96xf32> to vector<8x32xf32>
    %21 = vector.extract_strided_slice %19 {offsets = [0, 32], sizes = [8, 32], strides = [1, 1]} : vector<8x96xf32> to vector<8x32xf32>
    %22 = vector.extract_strided_slice %19 {offsets = [0, 64], sizes = [8, 32], strides = [1, 1]} : vector<8x96xf32> to vector<8x32xf32>
    %cst_15 = arith.constant 0.000000e+00 : f32
    %23 = vector.broadcast %cst_15 : f32 to vector<8x32xf32>
    %24 = arith.cmpf ogt, %20, %23 : vector<8x32xf32>
    %cst_16 = arith.constant 1.000000e+00 : f32
    %25 = vector.broadcast %cst_16 : f32 to vector<8x32xf32>
    %26 = arith.addf %20, %25 : vector<8x32xf32>
    %27 = math.exp %20 : vector<8x32xf32>
    %28 = arith.select %24, %26, %27 : vector<8x32xi1>, vector<8x32xf32>
    %cst_17 = arith.constant 0.000000e+00 : f32
    %29 = vector.broadcast %cst_17 : f32 to vector<8x32xf32>
    %30 = arith.cmpf ogt, %21, %29 : vector<8x32xf32>
    %cst_18 = arith.constant 1.000000e+00 : f32
    %31 = vector.broadcast %cst_18 : f32 to vector<8x32xf32>
    %32 = arith.addf %21, %31 : vector<8x32xf32>
    %33 = math.exp %21 : vector<8x32xf32>
    %34 = arith.select %30, %32, %33 : vector<8x32xi1>, vector<8x32xf32>
    %35 = vector.extract_strided_slice %28 {offsets = [0, 0], sizes = [8, 8], strides = [1, 1]} : vector<8x32xf32> to vector<8x8xf32>
    %36 = arith.truncf %35 : vector<8x8xf32> to vector<8x8xbf16>
    %37 = vector.extract_strided_slice %34 {offsets = [0, 0], sizes = [8, 8], strides = [1, 1]} : vector<8x32xf32> to vector<8x8xf32>
    %38 = arith.truncf %37 : vector<8x8xf32> to vector<8x8xbf16>
    %39 = vector.extract_strided_slice %22 {offsets = [0, 0], sizes = [8, 8], strides = [1, 1]} : vector<8x32xf32> to vector<8x8xf32>
    %40 = arith.truncf %39 : vector<8x8xf32> to vector<8x8xbf16>
    %cst_19 = arith.constant dense<0.000000e+00> : vector<8x8xf32>
    %41 = tpu.matmul %36, %38, %cst_19 {dimension_numbers = #tpu.dot_dimension_numbers<[1], [1], [0], [0], [0, 0, 1, 0], [], []>} : vector<8x8xbf16>, vector<8x8xbf16>, vector<8x8xf32> -> vector<8x8xf32>
    %cst_20 = arith.constant 0.000000e+00 : f32
    %42 = vector.broadcast %cst_20 : f32 to vector<8x8xf32>
    %43 = arith.select %11, %41, %42 : vector<8x8xi1>, vector<8x8xf32>
    %44 = arith.truncf %43 : vector<8x8xf32> to vector<8x8xbf16>
    %cst_21 = arith.constant dense<0.000000e+00> : vector<8x8xf32>
    %45 = tpu.matmul %44, %40, %cst_21 {dimension_numbers = #tpu.dot_dimension_numbers<[1], [0], [0], [1], [0, 0, 1, 1], [], []>} : vector<8x8xbf16>, vector<8x8xbf16>, vector<8x8xf32> -> vector<8x8xf32>
    %cst_22 = arith.constant dense<0.000000e+00> : vector<8xf32>
    %46 = vector.multi_reduction <add>, %43, %cst_22 [1] : vector<8x8xf32> to vector<8xf32>
    %47 = vector.shape_cast %46 : vector<8xf32> to vector<8x1xf32>
    %cst_23 = arith.constant 9.99999997E-7 : f32
    %48 = vector.broadcast %cst_23 : f32 to vector<8x1xf32>
    %49 = arith.addf %47, %48 : vector<8x1xf32>
    %50 = vector.broadcast %49 : vector<8x1xf32> to vector<8x8xf32>
    %51 = arith.divf %45, %50 : vector<8x8xf32>
    %52 = vector.extract_strided_slice %28 {offsets = [0, 8], sizes = [8, 8], strides = [1, 1]} : vector<8x32xf32> to vector<8x8xf32>
    %53 = arith.truncf %52 : vector<8x8xf32> to vector<8x8xbf16>
    %54 = vector.extract_strided_slice %34 {offsets = [0, 8], sizes = [8, 8], strides = [1, 1]} : vector<8x32xf32> to vector<8x8xf32>
    %55 = arith.truncf %54 : vector<8x8xf32> to vector<8x8xbf16>
    %56 = vector.extract_strided_slice %22 {offsets = [0, 8], sizes = [8, 8], strides = [1, 1]} : vector<8x32xf32> to vector<8x8xf32>
    %57 = arith.truncf %56 : vector<8x8xf32> to vector<8x8xbf16>
    %cst_24 = arith.constant dense<0.000000e+00> : vector<8x8xf32>
    %58 = tpu.matmul %53, %55, %cst_24 {dimension_numbers = #tpu.dot_dimension_numbers<[1], [1], [0], [0], [0, 0, 1, 0], [], []>} : vector<8x8xbf16>, vector<8x8xbf16>, vector<8x8xf32> -> vector<8x8xf32>
    %cst_25 = arith.constant 0.000000e+00 : f32
    %59 = vector.broadcast %cst_25 : f32 to vector<8x8xf32>
    %60 = arith.select %11, %58, %59 : vector<8x8xi1>, vector<8x8xf32>
    %61 = arith.truncf %60 : vector<8x8xf32> to vector<8x8xbf16>
    %cst_26 = arith.constant dense<0.000000e+00> : vector<8x8xf32>
    %62 = tpu.matmul %61, %57, %cst_26 {dimension_numbers = #tpu.dot_dimension_numbers<[1], [0], [0], [1], [0, 0, 1, 1], [], []>} : vector<8x8xbf16>, vector<8x8xbf16>, vector<8x8xf32> -> vector<8x8xf32>
    %cst_27 = arith.constant dense<0.000000e+00> : vector<8xf32>
    %63 = vector.multi_reduction <add>, %60, %cst_27 [1] : vector<8x8xf32> to vector<8xf32>
    %64 = vector.shape_cast %63 : vector<8xf32> to vector<8x1xf32>
    %cst_28 = arith.constant 9.99999997E-7 : f32
    %65 = vector.broadcast %cst_28 : f32 to vector<8x1xf32>
    %66 = arith.addf %64, %65 : vector<8x1xf32>
    %67 = vector.broadcast %66 : vector<8x1xf32> to vector<8x8xf32>
    %68 = arith.divf %62, %67 : vector<8x8xf32>
    %69 = vector.extract_strided_slice %28 {offsets = [0, 16], sizes = [8, 8], strides = [1, 1]} : vector<8x32xf32> to vector<8x8xf32>
    %70 = arith.truncf %69 : vector<8x8xf32> to vector<8x8xbf16>
    %71 = vector.extract_strided_slice %34 {offsets = [0, 16], sizes = [8, 8], strides = [1, 1]} : vector<8x32xf32> to vector<8x8xf32>
    %72 = arith.truncf %71 : vector<8x8xf32> to vector<8x8xbf16>
    %73 = vector.extract_strided_slice %22 {offsets = [0, 16], sizes = [8, 8], strides = [1, 1]} : vector<8x32xf32> to vector<8x8xf32>
    %74 = arith.truncf %73 : vector<8x8xf32> to vector<8x8xbf16>
    %cst_29 = arith.constant dense<0.000000e+00> : vector<8x8xf32>
    %75 = tpu.matmul %70, %72, %cst_29 {dimension_numbers = #tpu.dot_dimension_numbers<[1], [1], [0], [0], [0, 0, 1, 0], [], []>} : vector<8x8xbf16>, vector<8x8xbf16>, vector<8x8xf32> -> vector<8x8xf32>
    %cst_30 = arith.constant 0.000000e+00 : f32
    %76 = vector.broadcast %cst_30 : f32 to vector<8x8xf32>
    %77 = arith.select %11, %75, %76 : vector<8x8xi1>, vector<8x8xf32>
    %78 = arith.truncf %77 : vector<8x8xf32> to vector<8x8xbf16>
    %cst_31 = arith.constant dense<0.000000e+00> : vector<8x8xf32>
    %79 = tpu.matmul %78, %74, %cst_31 {dimension_numbers = #tpu.dot_dimension_numbers<[1], [0], [0], [1], [0, 0, 1, 1], [], []>} : vector<8x8xbf16>, vector<8x8xbf16>, vector<8x8xf32> -> vector<8x8xf32>
    %cst_32 = arith.constant dense<0.000000e+00> : vector<8xf32>
    %80 = vector.multi_reduction <add>, %77, %cst_32 [1] : vector<8x8xf32> to vector<8xf32>
    %81 = vector.shape_cast %80 : vector<8xf32> to vector<8x1xf32>
    %cst_33 = arith.constant 9.99999997E-7 : f32
    %82 = vector.broadcast %cst_33 : f32 to vector<8x1xf32>
    %83 = arith.addf %81, %82 : vector<8x1xf32>
    %84 = vector.broadcast %83 : vector<8x1xf32> to vector<8x8xf32>
    %85 = arith.divf %79, %84 : vector<8x8xf32>
    %86 = vector.extract_strided_slice %28 {offsets = [0, 24], sizes = [8, 8], strides = [1, 1]} : vector<8x32xf32> to vector<8x8xf32>
    %87 = arith.truncf %86 : vector<8x8xf32> to vector<8x8xbf16>
    %88 = vector.extract_strided_slice %34 {offsets = [0, 24], sizes = [8, 8], strides = [1, 1]} : vector<8x32xf32> to vector<8x8xf32>
    %89 = arith.truncf %88 : vector<8x8xf32> to vector<8x8xbf16>
    %90 = vector.extract_strided_slice %22 {offsets = [0, 24], sizes = [8, 8], strides = [1, 1]} : vector<8x32xf32> to vector<8x8xf32>
    %91 = arith.truncf %90 : vector<8x8xf32> to vector<8x8xbf16>
    %cst_34 = arith.constant dense<0.000000e+00> : vector<8x8xf32>
    %92 = tpu.matmul %87, %89, %cst_34 {dimension_numbers = #tpu.dot_dimension_numbers<[1], [1], [0], [0], [0, 0, 1, 0], [], []>} : vector<8x8xbf16>, vector<8x8xbf16>, vector<8x8xf32> -> vector<8x8xf32>
    %cst_35 = arith.constant 0.000000e+00 : f32
    %93 = vector.broadcast %cst_35 : f32 to vector<8x8xf32>
    %94 = arith.select %11, %92, %93 : vector<8x8xi1>, vector<8x8xf32>
    %95 = arith.truncf %94 : vector<8x8xf32> to vector<8x8xbf16>
    %cst_36 = arith.constant dense<0.000000e+00> : vector<8x8xf32>
    %96 = tpu.matmul %95, %91, %cst_36 {dimension_numbers = #tpu.dot_dimension_numbers<[1], [0], [0], [1], [0, 0, 1, 1], [], []>} : vector<8x8xbf16>, vector<8x8xbf16>, vector<8x8xf32> -> vector<8x8xf32>
    %cst_37 = arith.constant dense<0.000000e+00> : vector<8xf32>
    %97 = vector.multi_reduction <add>, %94, %cst_37 [1] : vector<8x8xf32> to vector<8xf32>
    %98 = vector.shape_cast %97 : vector<8xf32> to vector<8x1xf32>
    %cst_38 = arith.constant 9.99999997E-7 : f32
    %99 = vector.broadcast %cst_38 : f32 to vector<8x1xf32>
    %100 = arith.addf %98, %99 : vector<8x1xf32>
    %101 = vector.broadcast %100 : vector<8x1xf32> to vector<8x8xf32>
    %102 = arith.divf %96, %101 : vector<8x8xf32>
    %103 = tpu.concatenate %51, %68, %85, %102 in 1 : vector<8x8xf32>, vector<8x8xf32>, vector<8x8xf32>, vector<8x8xf32> -> vector<8x32xf32>
    %104 = arith.truncf %103 : vector<8x32xf32> to vector<8x32xbf16>
    %c0_39 = arith.constant 0 : index
    %c0_40 = arith.constant 0 : index
    %c0_41 = arith.constant 0 : index
    %105 = vector.load %arg6[%c0_39, %c0_40, %c0_41] : memref<1x32x32xbf16, #tpu.memory_space<vmem>>, vector<1x32x32xbf16>
    %106 = vector.shape_cast %105 : vector<1x32x32xbf16> to vector<32x32xbf16>
    %cst_42 = arith.constant dense<0.000000e+00> : vector<8x32xf32>
    %107 = tpu.matmul %104, %106, %cst_42 {dimension_numbers = #tpu.dot_dimension_numbers<[1], [0], [0], [1], [0, 0, 1, 1], [], []>} : vector<8x32xbf16>, vector<32x32xbf16>, vector<8x32xf32> -> vector<8x32xf32>
    %c0_43 = arith.constant 0 : index
    %c0_44 = arith.constant 0 : index
    %c0_45 = arith.constant 0 : index
    %108 = vector.load %arg7[%c0_43, %c0_44, %c0_45] : memref<1x1x32xf32, #tpu.memory_space<vmem>>, vector<1x1x32xf32>
    %109 = vector.shape_cast %108 : vector<1x1x32xf32> to vector<1x32xf32>
    %110 = vector.broadcast %109 : vector<1x32xf32> to vector<8x32xf32>
    %111 = arith.addf %107, %110 : vector<8x32xf32>
    %112 = arith.addf %4, %111 : vector<8x32xf32>
    %113 = vector.extract_strided_slice %6 {offsets = [0, 0], sizes = [1, 32], strides = [1, 1]} : vector<3x32xf32> to vector<1x32xf32>
    %114 = vector.extract_strided_slice %8 {offsets = [0, 0], sizes = [1, 32], strides = [1, 1]} : vector<3x32xf32> to vector<1x32xf32>
    %cst_46 = arith.constant dense<0.000000e+00> : vector<8xf32>
    %115 = vector.multi_reduction <add>, %112, %cst_46 [1] : vector<8x32xf32> to vector<8xf32>
    %116 = vector.shape_cast %115 : vector<8xf32> to vector<8x1xf32>
    %cst_47 = arith.constant 3.200000e+01 : f32
    %117 = vector.broadcast %cst_47 : f32 to vector<8x1xf32>
    %118 = arith.divf %116, %117 : vector<8x1xf32>
    %119 = vector.broadcast %118 : vector<8x1xf32> to vector<8x32xf32>
    %120 = arith.subf %112, %119 : vector<8x32xf32>
    %121 = arith.mulf %120, %120 : vector<8x32xf32>
    %cst_48 = arith.constant dense<0.000000e+00> : vector<8xf32>
    %122 = vector.multi_reduction <add>, %121, %cst_48 [1] : vector<8x32xf32> to vector<8xf32>
    %123 = vector.shape_cast %122 : vector<8xf32> to vector<8x1xf32>
    %cst_49 = arith.constant 3.200000e+01 : f32
    %124 = vector.broadcast %cst_49 : f32 to vector<8x1xf32>
    %125 = arith.divf %123, %124 : vector<8x1xf32>
    %126 = vector.broadcast %118 : vector<8x1xf32> to vector<8x32xf32>
    %127 = arith.subf %112, %126 : vector<8x32xf32>
    %cst_50 = arith.constant 9.99999974E-6 : f32
    %128 = vector.broadcast %cst_50 : f32 to vector<8x1xf32>
    %129 = arith.addf %125, %128 : vector<8x1xf32>
    %130 = math.rsqrt %129 : vector<8x1xf32>
    %131 = vector.broadcast %130 : vector<8x1xf32> to vector<8x32xf32>
    %132 = arith.mulf %127, %131 : vector<8x32xf32>
    %133 = vector.broadcast %113 : vector<1x32xf32> to vector<8x32xf32>
    %134 = arith.mulf %132, %133 : vector<8x32xf32>
    %135 = vector.broadcast %114 : vector<1x32xf32> to vector<8x32xf32>
    %136 = arith.addf %134, %135 : vector<8x32xf32>
    %c0_51 = arith.constant 0 : index
    %c0_52 = arith.constant 0 : index
    %c0_53 = arith.constant 0 : index
    %137 = vector.load %arg2[%c0_51, %c0_52, %c0_53] : memref<1x8x32xf32, #tpu.memory_space<vmem>>, vector<1x8x32xf32>
    %138 = vector.shape_cast %137 : vector<1x8x32xf32> to vector<8x32xf32>
    %139 = arith.truncf %138 : vector<8x32xf32> to vector<8x32xbf16>
    %c0_54 = arith.constant 0 : index
    %c0_55 = arith.constant 0 : index
    %c0_56 = arith.constant 0 : index
    %140 = vector.load %arg8[%c0_54, %c0_55, %c0_56] : memref<1x32x32xbf16, #tpu.memory_space<vmem>>, vector<1x32x32xbf16>
    %141 = vector.shape_cast %140 : vector<1x32x32xbf16> to vector<32x32xbf16>
    %cst_57 = arith.constant dense<0.000000e+00> : vector<8x32xf32>
    %142 = tpu.matmul %139, %141, %cst_57 {dimension_numbers = #tpu.dot_dimension_numbers<[1], [0], [0], [1], [0, 0, 1, 1], [], []>} : vector<8x32xbf16>, vector<32x32xbf16>, vector<8x32xf32> -> vector<8x32xf32>
    %c0_58 = arith.constant 0 : index
    %c0_59 = arith.constant 0 : index
    %c0_60 = arith.constant 0 : index
    %143 = vector.load %arg9[%c0_58, %c0_59, %c0_60] : memref<1x1x32xf32, #tpu.memory_space<vmem>>, vector<1x1x32xf32>
    %144 = vector.shape_cast %143 : vector<1x1x32xf32> to vector<1x32xf32>
    %145 = vector.broadcast %144 : vector<1x32xf32> to vector<8x32xf32>
    %146 = arith.addf %142, %145 : vector<8x32xf32>
    %147 = arith.addf %136, %146 : vector<8x32xf32>
    %148 = vector.extract_strided_slice %6 {offsets = [1, 0], sizes = [1, 32], strides = [1, 1]} : vector<3x32xf32> to vector<1x32xf32>
    %149 = vector.extract_strided_slice %8 {offsets = [1, 0], sizes = [1, 32], strides = [1, 1]} : vector<3x32xf32> to vector<1x32xf32>
    %cst_61 = arith.constant dense<0.000000e+00> : vector<8xf32>
    %150 = vector.multi_reduction <add>, %147, %cst_61 [1] : vector<8x32xf32> to vector<8xf32>
    %151 = vector.shape_cast %150 : vector<8xf32> to vector<8x1xf32>
    %cst_62 = arith.constant 3.200000e+01 : f32
    %152 = vector.broadcast %cst_62 : f32 to vector<8x1xf32>
    %153 = arith.divf %151, %152 : vector<8x1xf32>
    %154 = vector.broadcast %153 : vector<8x1xf32> to vector<8x32xf32>
    %155 = arith.subf %147, %154 : vector<8x32xf32>
    %156 = arith.mulf %155, %155 : vector<8x32xf32>
    %cst_63 = arith.constant dense<0.000000e+00> : vector<8xf32>
    %157 = vector.multi_reduction <add>, %156, %cst_63 [1] : vector<8x32xf32> to vector<8xf32>
    %158 = vector.shape_cast %157 : vector<8xf32> to vector<8x1xf32>
    %cst_64 = arith.constant 3.200000e+01 : f32
    %159 = vector.broadcast %cst_64 : f32 to vector<8x1xf32>
    %160 = arith.divf %158, %159 : vector<8x1xf32>
    %161 = vector.broadcast %153 : vector<8x1xf32> to vector<8x32xf32>
    %162 = arith.subf %147, %161 : vector<8x32xf32>
    %cst_65 = arith.constant 9.99999974E-6 : f32
    %163 = vector.broadcast %cst_65 : f32 to vector<8x1xf32>
    %164 = arith.addf %160, %163 : vector<8x1xf32>
    %165 = math.rsqrt %164 : vector<8x1xf32>
    %166 = vector.broadcast %165 : vector<8x1xf32> to vector<8x32xf32>
    %167 = arith.mulf %162, %166 : vector<8x32xf32>
    %168 = vector.broadcast %148 : vector<1x32xf32> to vector<8x32xf32>
    %169 = arith.mulf %167, %168 : vector<8x32xf32>
    %170 = vector.broadcast %149 : vector<1x32xf32> to vector<8x32xf32>
    %171 = arith.addf %169, %170 : vector<8x32xf32>
    %172 = arith.truncf %171 : vector<8x32xf32> to vector<8x32xbf16>
    %c0_66 = arith.constant 0 : index
    %c0_67 = arith.constant 0 : index
    %c0_68 = arith.constant 0 : index
    %173 = vector.load %arg10[%c0_66, %c0_67, %c0_68] : memref<1x32x64xbf16, #tpu.memory_space<vmem>>, vector<1x32x64xbf16>
    %174 = vector.shape_cast %173 : vector<1x32x64xbf16> to vector<32x64xbf16>
    %cst_69 = arith.constant dense<0.000000e+00> : vector<8x64xf32>
    %175 = tpu.matmul %172, %174, %cst_69 {dimension_numbers = #tpu.dot_dimension_numbers<[1], [0], [0], [1], [0, 0, 1, 1], [], []>} : vector<8x32xbf16>, vector<32x64xbf16>, vector<8x64xf32> -> vector<8x64xf32>
    %c0_70 = arith.constant 0 : index
    %c0_71 = arith.constant 0 : index
    %c0_72 = arith.constant 0 : index
    %176 = vector.load %arg11[%c0_70, %c0_71, %c0_72] : memref<1x1x64xf32, #tpu.memory_space<vmem>>, vector<1x1x64xf32>
    %177 = vector.shape_cast %176 : vector<1x1x64xf32> to vector<1x64xf32>
    %178 = vector.broadcast %177 : vector<1x64xf32> to vector<8x64xf32>
    %179 = arith.addf %175, %178 : vector<8x64xf32>
    %cst_73 = arith.constant 5.000000e-01 : f32
    %180 = vector.broadcast %cst_73 : f32 to vector<8x64xf32>
    %181 = arith.mulf %180, %179 : vector<8x64xf32>
    %cst_74 = arith.constant 0.707106769 : f32
    %182 = vector.broadcast %cst_74 : f32 to vector<8x64xf32>
    %183 = arith.mulf %179, %182 : vector<8x64xf32>
    %184 = math.erf %183 : vector<8x64xf32>
    %cst_75 = arith.constant 1.000000e+00 : f32
    %185 = vector.broadcast %cst_75 : f32 to vector<8x64xf32>
    %186 = arith.addf %185, %184 : vector<8x64xf32>
    %187 = arith.mulf %181, %186 : vector<8x64xf32>
    %188 = arith.truncf %187 : vector<8x64xf32> to vector<8x64xbf16>
    %c0_76 = arith.constant 0 : index
    %c0_77 = arith.constant 0 : index
    %c0_78 = arith.constant 0 : index
    %189 = vector.load %arg12[%c0_76, %c0_77, %c0_78] : memref<1x64x32xbf16, #tpu.memory_space<vmem>>, vector<1x64x32xbf16>
    %190 = vector.shape_cast %189 : vector<1x64x32xbf16> to vector<64x32xbf16>
    %cst_79 = arith.constant dense<0.000000e+00> : vector<8x32xf32>
    %191 = tpu.matmul %188, %190, %cst_79 {dimension_numbers = #tpu.dot_dimension_numbers<[1], [0], [0], [1], [0, 0, 1, 1], [], []>} : vector<8x64xbf16>, vector<64x32xbf16>, vector<8x32xf32> -> vector<8x32xf32>
    %c0_80 = arith.constant 0 : index
    %c0_81 = arith.constant 0 : index
    %c0_82 = arith.constant 0 : index
    %192 = vector.load %arg13[%c0_80, %c0_81, %c0_82] : memref<1x1x32xf32, #tpu.memory_space<vmem>>, vector<1x1x32xf32>
    %193 = vector.shape_cast %192 : vector<1x1x32xf32> to vector<1x32xf32>
    %194 = vector.broadcast %193 : vector<1x32xf32> to vector<8x32xf32>
    %195 = arith.addf %191, %194 : vector<8x32xf32>
    %196 = arith.addf %171, %195 : vector<8x32xf32>
    %197 = vector.extract_strided_slice %6 {offsets = [2, 0], sizes = [1, 32], strides = [1, 1]} : vector<3x32xf32> to vector<1x32xf32>
    %198 = vector.extract_strided_slice %8 {offsets = [2, 0], sizes = [1, 32], strides = [1, 1]} : vector<3x32xf32> to vector<1x32xf32>
    %cst_83 = arith.constant dense<0.000000e+00> : vector<8xf32>
    %199 = vector.multi_reduction <add>, %196, %cst_83 [1] : vector<8x32xf32> to vector<8xf32>
    %200 = vector.shape_cast %199 : vector<8xf32> to vector<8x1xf32>
    %cst_84 = arith.constant 3.200000e+01 : f32
    %201 = vector.broadcast %cst_84 : f32 to vector<8x1xf32>
    %202 = arith.divf %200, %201 : vector<8x1xf32>
    %203 = vector.broadcast %202 : vector<8x1xf32> to vector<8x32xf32>
    %204 = arith.subf %196, %203 : vector<8x32xf32>
    %205 = arith.mulf %204, %204 : vector<8x32xf32>
    %cst_85 = arith.constant dense<0.000000e+00> : vector<8xf32>
    %206 = vector.multi_reduction <add>, %205, %cst_85 [1] : vector<8x32xf32> to vector<8xf32>
    %207 = vector.shape_cast %206 : vector<8xf32> to vector<8x1xf32>
    %cst_86 = arith.constant 3.200000e+01 : f32
    %208 = vector.broadcast %cst_86 : f32 to vector<8x1xf32>
    %209 = arith.divf %207, %208 : vector<8x1xf32>
    %210 = vector.broadcast %202 : vector<8x1xf32> to vector<8x32xf32>
    %211 = arith.subf %196, %210 : vector<8x32xf32>
    %cst_87 = arith.constant 9.99999974E-6 : f32
    %212 = vector.broadcast %cst_87 : f32 to vector<8x1xf32>
    %213 = arith.addf %209, %212 : vector<8x1xf32>
    %214 = math.rsqrt %213 : vector<8x1xf32>
    %215 = vector.broadcast %214 : vector<8x1xf32> to vector<8x32xf32>
    %216 = arith.mulf %211, %215 : vector<8x32xf32>
    %217 = vector.broadcast %197 : vector<1x32xf32> to vector<8x32xf32>
    %218 = arith.mulf %216, %217 : vector<8x32xf32>
    %219 = vector.broadcast %198 : vector<1x32xf32> to vector<8x32xf32>
    %220 = arith.addf %218, %219 : vector<8x32xf32>
    %c1_i32 = arith.constant 1 : i32
    %221 = arith.cmpi slt, %arg1, %c1_i32 : i32
    %222 = arith.extui %221 : i1 to i32
    %c0_i32_88 = arith.constant 0 : i32
    %223 = arith.cmpi ne, %222, %c0_i32_88 : i32
    scf.if %223 {
      %c0_91 = arith.constant 0 : index
      %c0_92 = arith.constant 0 : index
      %c0_93 = arith.constant 0 : index
      %227 = vector.load %arg18[%c0_91, %c0_92, %c0_93] : memref<1x8x32xf32, #tpu.memory_space<vmem>>, vector<1x8x32xf32>
      %228 = vector.shape_cast %227 : vector<1x8x32xf32> to vector<8x32xf32>
      %229 = vector.shape_cast %220 : vector<8x32xf32> to vector<1x8x32xf32>
      tpu.vector_store %arg18[%c0_91, %c0_92, %c0_93], %229 {strides = array<i32>} : memref<1x8x32xf32, #tpu.memory_space<vmem>>, vector<1x8x32xf32>,
    } else {
    }
    %c1_i32_89 = arith.constant 1 : i32
    %224 = arith.cmpi eq, %arg1, %c1_i32_89 : i32
    %225 = arith.extui %224 : i1 to i32
    %c0_i32_90 = arith.constant 0 : i32
    %226 = arith.cmpi ne, %225, %c0_i32_90 : i32
    scf.if %226 {
      %c0_91 = arith.constant 0 : index
      %c0_92 = arith.constant 0 : index
      %227 = vector.load %arg16[%c0_91, %c0_92] : memref<1x32xf32, #tpu.memory_space<vmem>>, vector<1x32xf32>
      %c0_93 = arith.constant 0 : index
      %c0_94 = arith.constant 0 : index
      %228 = vector.load %arg17[%c0_93, %c0_94] : memref<1x32xf32, #tpu.memory_space<vmem>>, vector<1x32xf32>
      %cst_95 = arith.constant dense<0.000000e+00> : vector<8xf32>
      %229 = vector.multi_reduction <add>, %220, %cst_95 [1] : vector<8x32xf32> to vector<8xf32>
      %230 = vector.shape_cast %229 : vector<8xf32> to vector<8x1xf32>
      %cst_96 = arith.constant 3.200000e+01 : f32
      %231 = vector.broadcast %cst_96 : f32 to vector<8x1xf32>
      %232 = arith.divf %230, %231 : vector<8x1xf32>
      %233 = vector.broadcast %232 : vector<8x1xf32> to vector<8x32xf32>
      %234 = arith.subf %220, %233 : vector<8x32xf32>
      %235 = arith.mulf %234, %234 : vector<8x32xf32>
      %cst_97 = arith.constant dense<0.000000e+00> : vector<8xf32>
      %236 = vector.multi_reduction <add>, %235, %cst_97 [1] : vector<8x32xf32> to vector<8xf32>
      %237 = vector.shape_cast %236 : vector<8xf32> to vector<8x1xf32>
      %cst_98 = arith.constant 3.200000e+01 : f32
      %238 = vector.broadcast %cst_98 : f32 to vector<8x1xf32>
      %239 = arith.divf %237, %238 : vector<8x1xf32>
      %240 = vector.broadcast %232 : vector<8x1xf32> to vector<8x32xf32>
      %241 = arith.subf %220, %240 : vector<8x32xf32>
      %cst_99 = arith.constant 9.99999974E-6 : f32
      %242 = vector.broadcast %cst_99 : f32 to vector<8x1xf32>
      %243 = arith.addf %239, %242 : vector<8x1xf32>
      %244 = math.rsqrt %243 : vector<8x1xf32>
      %245 = vector.broadcast %244 : vector<8x1xf32> to vector<8x32xf32>
      %246 = arith.mulf %241, %245 : vector<8x32xf32>
      %247 = vector.broadcast %227 : vector<1x32xf32> to vector<8x32xf32>
      %248 = arith.mulf %246, %247 : vector<8x32xf32>
      %249 = vector.broadcast %228 : vector<1x32xf32> to vector<8x32xf32>
      %250 = arith.addf %248, %249 : vector<8x32xf32>
      %c0_100 = arith.constant 0 : index
      %c0_101 = arith.constant 0 : index
      %c0_102 = arith.constant 0 : index
      %251 = vector.load %arg18[%c0_100, %c0_101, %c0_102] : memref<1x8x32xf32, #tpu.memory_space<vmem>>, vector<1x8x32xf32>
      %252 = vector.shape_cast %251 : vector<1x8x32xf32> to vector<8x32xf32>
      %253 = vector.shape_cast %250 : vector<8x32xf32> to vector<1x8x32xf32>
      tpu.vector_store %arg18[%c0_100, %c0_101, %c0_102], %253 {strides = array<i32>} : memref<1x8x32xf32, #tpu.memory_space<vmem>>, vector<1x8x32xf32>,
    } else {
    }
    return
  }
  func.func @transform_0(%arg0: i32, %arg1: i32) -> (i32, i32, i32) {
    %c0_i32 = arith.constant 0 : i32
    %c0_i32_0 = arith.constant 0 : i32
    %c0_i32_1 = arith.constant 0 : i32
    return %arg0, %c0_i32, %c0_i32_0 : i32, i32, i32
  }
  func.func @transform_1(%arg0: i32, %arg1: i32) -> (i32, i32, i32) {
    %c0_i32 = arith.constant 0 : i32
    %c0_i32_0 = arith.constant 0 : i32
    %c0_i32_1 = arith.constant 0 : i32
    return %arg0, %c0_i32, %c0_i32_0 : i32, i32, i32
  }
  func.func @transform_2(%arg0: i32, %arg1: i32) -> (i32, i32, i32) {
    %c0_i32 = arith.constant 0 : i32
    %c0_i32_0 = arith.constant 0 : i32
    %c0_i32_1 = arith.constant 0 : i32
    return %arg1, %c0_i32, %c0_i32_0 : i32, i32, i32
  }
  func.func @transform_3(%arg0: i32, %arg1: i32) -> (i32, i32, i32) {
    %c0_i32 = arith.constant 0 : i32
    %c0_i32_0 = arith.constant 0 : i32
    %c0_i32_1 = arith.constant 0 : i32
    return %arg1, %c0_i32, %c0_i32_0 : i32, i32, i32
  }
  func.func @transform_4(%arg0: i32, %arg1: i32) -> (i32, i32, i32) {
    %c0_i32 = arith.constant 0 : i32
    %c0_i32_0 = arith.constant 0 : i32
    %c0_i32_1 = arith.constant 0 : i32
    return %arg1, %c0_i32, %c0_i32_0 : i32, i32, i32
  }
  func.func @transform_5(%arg0: i32, %arg1: i32) -> (i32, i32, i32) {
    %c0_i32 = arith.constant 0 : i32
    %c0_i32_0 = arith.constant 0 : i32
    %c0_i32_1 = arith.constant 0 : i32
    return %arg1, %c0_i32, %c0_i32_0 : i32, i32, i32
  }
  func.func @transform_6(%arg0: i32, %arg1: i32) -> (i32, i32, i32) {
    %c0_i32 = arith.constant 0 : i32
    %c0_i32_0 = arith.constant 0 : i32
    %c0_i32_1 = arith.constant 0 : i32
    return %arg1, %c0_i32, %c0_i32_0 : i32, i32, i32
  }
  func.func @transform_7(%arg0: i32, %arg1: i32) -> (i32, i32, i32) {
    %c0_i32 = arith.constant 0 : i32
    %c0_i32_0 = arith.constant 0 : i32
    %c0_i32_1 = arith.constant 0 : i32
    return %arg1, %c0_i32, %c0_i32_0 : i32, i32, i32
  }
  func.func @transform_8(%arg0: i32, %arg1: i32) -> (i32, i32, i32) {
    %c0_i32 = arith.constant 0 : i32
    %c0_i32_0 = arith.constant 0 : i32
    %c0_i32_1 = arith.constant 0 : i32
    return %arg1, %c0_i32, %c0_i32_0 : i32, i32, i32
  }
  func.func @transform_9(%arg0: i32, %arg1: i32) -> (i32, i32, i32) {
    %c0_i32 = arith.constant 0 : i32
    %c0_i32_0 = arith.constant 0 : i32
    %c0_i32_1 = arith.constant 0 : i32
    return %arg1, %c0_i32, %c0_i32_0 : i32, i32, i32
  }
  func.func @transform_10(%arg0: i32, %arg1: i32) -> (i32, i32, i32) {
    %c0_i32 = arith.constant 0 : i32
    %c0_i32_0 = arith.constant 0 : i32
    %c0_i32_1 = arith.constant 0 : i32
    return %arg1, %c0_i32, %c0_i32_0 : i32, i32, i32
  }
  func.func @transform_11(%arg0: i32, %arg1: i32) -> (i32, i32, i32) {
    %c0_i32 = arith.constant 0 : i32
    %c0_i32_0 = arith.constant 0 : i32
    %c0_i32_1 = arith.constant 0 : i32
    return %arg1, %c0_i32, %c0_i32_0 : i32, i32, i32
  }
  func.func @transform_12(%arg0: i32, %arg1: i32) -> (i32, i32, i32) {
    %c0_i32 = arith.constant 0 : i32
    %c0_i32_0 = arith.constant 0 : i32
    %c0_i32_1 = arith.constant 0 : i32
    return %arg1, %c0_i32, %c0_i32_0 : i32, i32, i32
  }
  func.func @transform_13(%arg0: i32, %arg1: i32) -> (i32, i32, i32) {
    %c0_i32 = arith.constant 0 : i32
    %c0_i32_0 = arith.constant 0 : i32
    %c0_i32_1 = arith.constant 0 : i32
    return %arg1, %c0_i32, %c0_i32_0 : i32, i32, i32
  }
  func.func @transform_14(%arg0: i32, %arg1: i32) -> (i32, i32) {
    %c0_i32 = arith.constant 0 : i32
    %c0_i32_0 = arith.constant 0 : i32
    %c0_i32_1 = arith.constant 0 : i32
    return %c0_i32, %c0_i32_0 : i32, i32
  }
  func.func @transform_15(%arg0: i32, %arg1: i32) -> (i32, i32) {
    %c0_i32 = arith.constant 0 : i32
    %c0_i32_0 = arith.constant 0 : i32
    %c0_i32_1 = arith.constant 0 : i32
    return %c0_i32, %c0_i32_0 : i32, i32
  }
  func.func @transform_16(%arg0: i32, %arg1: i32) -> (i32, i32, i32) {
    %c0_i32 = arith.constant 0 : i32
    %c0_i32_0 = arith.constant 0 : i32
    %c0_i32_1 = arith.constant 0 : i32
    return %arg0, %c0_i32, %c0_i32_0 : i32, i32, i32
  }
}

</mosaic_0001>

<bundles_post_ra>
// kernel: decoder_forward.1
= control target key start
LH: loop header
LB: loop body
LE: loop exit
PB: predicated region body
PF: predicated region fallthrough
CT: control target
= control target key end

     0   :  { %s2777_s0 = inlined_call_operand.vmem [shape: f32[2,8,32], index: 0, kind: input, shape index: {}]   ;;  %s2778_s1 = inlined_call_operand.vmem [shape: f32[2,8,32], index: 1, kind: input, shape index: {}]   ;;  %s2779_s2 = inlined_call_operand.vmem [shape: bf16[2,32,96], index: 2, kind: input, shape index: {}]   ;;  %s2780_s3 = inlined_call_operand.vmem [shape: f32[2,1,96], index: 3, kind: input, shape index: {}]   ;;  %s2781_s4 = inlined_call_operand.vmem [shape: bf16[2,32,32], index: 4, kind: input, shape index: {}]   ;;  %s2782_s5 = inlined_call_operand.vmem [shape: f32[2,1,32], index: 5, kind: input, shape index: {}]   ;;  %s2783_s6 = inlined_call_operand.vmem [shape: bf16[2,32,32], index: 6, kind: input, shape index: {}]   ;;  %s2784_s7 = inlined_call_operand.vmem [shape: f32[2,1,32], index: 7, kind: input, shape index: {}]   ;;  %s2785_s8 = inlined_call_operand.vmem [shape: bf16[2,32,64], index: 8, kind: input, shape index: {}]   ;;  %s2786_s9 = inlined_call_operand.vmem [shape: f32[2,1,64], index: 9, kind: input, shape index: {}]   ;;  %s2787_s10 = inlined_call_operand.vmem [shape: bf16[2,64,32], index: 10, kind: input, shape index: {}]   ;;  %s2788_s11 = inlined_call_operand.vmem [shape: f32[2,1,32], index: 11, kind: input, shape index: {}]   ;;  %s2789_s12 = inlined_call_operand.vmem [shape: f32[2,3,32], index: 12, kind: input, shape index: {}]   ;;  %s2790_s13 = inlined_call_operand.vmem [shape: f32[2,3,32], index: 13, kind: input, shape index: {}]   ;;  %s2791_s14 = inlined_call_operand.vmem [shape: f32[1,32], index: 14, kind: input, shape index: {}]   ;;  %s2792_s15 = inlined_call_operand.vmem [shape: f32[1,32], index: 15, kind: input, shape index: {}]   ;;  %s2793_s16 = inlined_call_operand.hbm [shape: f32[2,8,32], index: 16, kind: output, shape index: {}]  }
   0x1   :  { %2809 = sst [smem:[#allocation18_spill]] %s2777_s0 }
   0x2   :  { %2810 = sst [smem:[#allocation19_spill]] %s2778_s1 }
   0x3   :  { %2811 = sst [smem:[#allocation20_spill]] %s2779_s2 }
   0x4   :  { %2812 = sst [smem:[#allocation21_spill]] %s2781_s4 }
   0x5   :  { %2813 = sst [smem:[#allocation22_spill]] %s2783_s6 }
   0x6   :  { %2814 = sst [smem:[#allocation23_spill]] %s2785_s8 }
   0x7   :  { %2815 = sst [smem:[#allocation24_spill]] %s2789_s12 }
   0x8   :  { %2816 = sst [smem:[#allocation25_spill]] %s2790_s13 }
   0x9   :  { %2817 = sst [smem:[#allocation26_spill]] %s2791_s14 }
   0xa   :  { %2818 = sst [smem:[#allocation27_spill]] %s2792_s15 }
   0xb   :  { %2819 = sst [smem:[#allocation28_spill]] %s2793_s16 }
   0xc   :  { %21 = vsyncpa [#allocation3], 0 }
   0xd   :  { %23 = vsyncpa [#allocation3 + $0x1], 0  ;;  %s2418_s21 = smov 0   ;;  %s2420_s22 = smov 0  }
   0xe   :  { %s2422_s23 = smov 0   ;;  %s2424_s24 = smov 0  }
   0xf   :  { %s2426_s25 = smov 0   ;;  %s2428_s26 = smov 0  }
  0x10   :  { %s2430_s27 = smov 0   ;;  %s2432_s28 = smov 0  }
  0x11 LB: > { %2820 = sst [smem:[#allocation5_spill]] %s2286_s21  ;;  %s1912_s29 = sadd.s32 4294967295, %s2314_s28   ;;  %s2314_s28 = sphi %s2432_s28, %s29_s28   ;;  %s2310_s27 = sphi %s2430_s27, %s2866_s27   ;;  %s2306_s26 = sphi %s2428_s26, %s2865_s26   ;;  %s2302_s25 = sphi %s2426_s25, %s2864_s25   ;;  %s2298_s24 = sphi %s2424_s24, %s2863_s24   ;;  %s2294_s23 = sphi %s2422_s23, %s2862_s23   ;;  %s2290_s22 = sphi %s2420_s22, %s2861_s22   ;;  %s2286_s21 = sphi %s2418_s21, %s2860_s21  }
  0x12   : > { %2821 = sst [smem:[#allocation6_spill]] %s2290_s22  ;;  %s1913_s30 = sadd.s32 4294967294, %s2314_s28  }
  0x13   : > { %2822 = sst [smem:[#allocation7_spill]] %s2294_s23  ;;  %s38_s0 = sadd.s32 1, %s2306_s26 }
  0x14   : > { %2823 = sst [smem:[#allocation8_spill]] %s2298_s24  ;;  %p39_p0 = scmp.ge.s32.totalorder %s38_s0, 2 }
  0x15   : > { %2824 = sst [smem:[#allocation9_spill]] %s2302_s25  ;;  %s41_s17 = sadd.s32 1, %s2310_s27 }
  0x16   : > { %2825 = sst [smem:[#allocation10_spill]] %s2306_s26  ;;  %p464_p1 = scmp.ne.s32.totalorder %s2294_s23, %s2290_s22 }
  0x17   : > { %2826 = sst [smem:[#allocation11_spill]] %s2310_s27  ;;  %p465_p2 = scmp.eq.s32.totalorder %s1912_s29, 3 }
  0x18   : > { %2827 = sst [smem:[#allocation12_spill]] %s2314_s28  ;;  %s2868_s0 = smov (%p39_p0, %s38_s0), 0 }
  0x19   : > { %2828 = sst [smem:[#allocation13_spill]] %s2868_s0  ;;  %s2870_s17 = smov (!%p39_p0, %s41_s17), %s2310_s27 }
  0x1a   : > { %p2467_p3 = por %p465_p2, %p464_p1  ;;  %p470_p4 = scmp.ne.s32.totalorder %s2290_s22, %s2286_s21 }
  0x1b   : > { %p43_p5 = scmp.ge.s32.totalorder %s2870_s17, 2  ;;  %p471_p6 = scmp.eq.s32.totalorder %s1913_s30, 3 }
  0x1c   : > { %s2829_s18 = scalar_select %p2467_p3, 1, 0 }
  0x1d   : > { %p1916_p7 = scmp.ge.s32.totalorder %s2314_s28, 1  ;;  %p593_p8 = scmp.lt.s32.totalorder %s2314_s28, 5 }
  0x1e   : > { %2830 = sst [smem:[#allocation14_spill]] %s2829_s18  ;;  %s2872_s17 = smov (%p43_p5, %s2870_s17), 0 }
  0x1f   : > { %2831 = sst [smem:[#allocation15_spill]] %s2872_s17  ;;  %p2477_p9 = por %p471_p6, %p470_p4 }
  0x20   : > { %p594_p10 = pnand %p1916_p7, %p593_p8  ;;  %s451_s20 = ssub.s32 %s2310_s27, %s2872_s17 }
  0x21   : > { %s2832_s19 = scalar_select %p2477_p9, 1, 0 }
  0x22   : > { %s454_s29 = sadd.s32 1, %s2294_s23  ;;  %p452_p11 = scmp.eq.s32.totalorder %s451_s20, 0 }
  0x23   : > { %2833 = sst [smem:[#allocation16_spill]] %s2832_s19  ;;  %597 = sbr.rel (%p594_p10) target bundleno = 2955 (0xb8b), region = 84 }
  0x24   : > { %s2485_s0 = scalar_select %p452_p11, %s2294_s23, %s454_s29  }
  0x25   : > { %s2800_s30 = sand.u32 (!%p594_p10), 1, %s2290_s22   ;;  %p694_p12 = scmp.lt.s32.totalorder (!%p594_p10), %s2302_s25, 1 }
  0x26   : > { %2834 = sst [smem:[#allocation17_spill]] %s2485_s0  ;;  %s1917_s26 = sshll.u32 (!%p594_p10), %s2800_s30, 3 }
  0x27   : > { %p702_p13 = scmp.lt.s32.totalorder (!%p594_p10), %s2298_s24, 1  ;;  %s2835_s27 = sld [smem:[#allocation18_spill]] (!%p594_p10) }
  0x28   : > { %s2836_s1 = sld [smem:[#allocation19_spill]] (!%p594_p10)  ;;  %s2837_s2 = sld [smem:[#allocation20_spill]] (!%p594_p10) }
  0x29   : > { %s2838_s4 = sld [smem:[#allocation21_spill]] (!%p594_p10)  ;;  %s2839_s6 = sld [smem:[#allocation22_spill]] (!%p594_p10) }
  0x2a   : > { %s695_s21 = scalar_select %p694_p12, %s2302_s25, 1 }
  0x2b   : > { %s2494_s19 = scalar_select %p702_p13, %s2298_s24, 1 }
  0x2c   : > { %s1918_s20 = sshll.u32 %s695_s21, 3  ;;  %s2840_s8 = sld [smem:[#allocation23_spill]] }
  0x2d   : > { %s2499_s0 = scalar_lea.vmem %s2835_s27, %s1918_s20  ;;  %s1971_s16 = sshll.u32 %s2494_s19, 4 }
  0x2e   : > { %s701_s28 = scalar_lea.vmem %s2836_s1, %s1918_s20  ;;  %s706_s24 = scalar_lea.vmem %s2837_s2, %s1971_s16 }
  0x2f   : > { %s2515_s12 = scalar_lea.vmem %s2838_s4, %s1971_s16  ;;  %s2524_s20 = scalar_lea.vmem %s2839_s6, %s1971_s16 }
  0x30   : > { %s1975_s27 = sshll.u32 %s2494_s19, 5  ;;  %s741_s22 = scalar_lea.vmem %s2788_s11, %s2494_s19 }
  0x31   : > { %s2543_s23 = scalar_lea.vmem %s2787_s10, %s1975_s27  ;;  %s1930_s18 = sshll.u32 %s2494_s19, 2 }
  0x32   : > { %s2533_s1 = scalar_lea.vmem %s2840_s8, %s1971_s16  ;;  %s2841_s14 = sld [smem:[#allocation24_spill]] }
  0x33   : > { %s2842_s13 = sld [smem:[#allocation25_spill]]  ;;  %s2560_s2 = scalar_lea.vmem [#allocation2], %s1917_s26 }
  0x34   : > { %s2843_s29 = sld [smem:[#allocation8_spill]] }
  0x38   : > { %s2553_s16 = scalar_lea.vmem %s2841_s14, %s1930_s18 }
  0x39   : > { %s2558_s21 = scalar_lea.vmem %s2842_s13, %s1930_s18 }
  0x3a   : > { %p1932_p0 = scmp.ne.s32.totalorder %s2843_s29, 0 }
  0x3b   : > { %v755_v0 = vld [vmem:[%s701_s28] sm:$0xff] (!%p1932_p0)  ;;  %vm756_vm0 = vcmask (!%p1932_p0), 261120  }
  0x3c   : > { %754 = sbr.rel (%p1932_p0) target bundleno = 67 (0x43), region = 88  ;;  %757 = vst.msk [vmem:[%s2560_s2] sm:$0xff] (!%p1932_p0), %vm756_vm0, %v755_v0 }
  0x43 PF: > { %v2188_v1 = vld [vmem:[%s706_s24] sm:$0xff]   ;;  %v2316_v2 = vmov 0.0   ;;  %v2189_v3 = vld [vmem:[%s706_s24 + $0x8] sm:$0xff]   ;;  %vm2317_vm1 = vmmov 0   ;;  %vm790_vm2 = vcmask 261120   ;;  %s2844_s8 = scalar_lea.vmem %s2780_s3, %s2494_s19  ;;  %s2318_s24 = smov 120   ;;  %v761_v31 = vlaneseq }
  0x44   : > { %2009 = vmatprep.subr.bf16.mxu1 %v2316_v2  ;;  %2023 = vmatprep.subr.bf16.mxu0 %v2316_v2  ;;  %v2569_v4 = vld [vmem:[%s2560_s2] sm:$0xff]  ;;  %s2319_s25 = smov 96   ;;  %s2320_s26 = smov 80   ;;  %vm844_vm4 = vcmask 64512   ;;  %vm899_vm5 = vcmask 1043456   ;;  %vm1280_vm7 = vcmask 130048  }
  0x45   : > { %2010 = vmatpush3.bf16.msra.mxu1 %v2188_v1  ;;  %2013 = vmatprep.mubr.msk.bf16.mxu1 %vm2317_vm1, %v2316_v2  ;;  %v766_v5 = vpack.c.bf16 %v2569_v4, %v2569_v4  ;;  %v1933_v6 = vld [vmem:[%s2844_s8] ss:$0 sm:$0xff]  ;;  %s2321_s28 = smov 88   ;;  %s2322_s27 = smov 72   ;;  %v2607_v32 = vshrl.u32 %v761_v31, 7  ;;  %v764_v33 = vand.u32 127, %v761_v31 }
  0x46   : > { %2011 = vmatprep.subr.bf16.mxu1 %v2316_v2  ;;  %2025 = vmatprep.mubr.msk.bf16.mxu0 %vm2317_vm1, %v2316_v2  ;;  %s2323_s17 = smov 112   ;;  %s2324_s30 = smov 64   ;;  %vm1282_vm8 = vcmask 195584   ;;  %vm1580_vm9 = vcmask 523264  }
  0x47   : > { %s2325_s18 = smov 104   ;;  %s2326_s14 = smov 48   ;;  %vm765_vm6 = vcmp.le.s32.totalorder %v764_v33, %v2607_v32 }
  0x48   : > { %s2327_s15 = smov 56   ;;  %s2328_s13 = smov 40  }
  0x49   : > { %2012 = vmatpush3.bf16.msra.mxu1 %v2189_v3  ;;  %s2329_s29 = smov 8   ;;  %s2330_s4 = smov 16  }
  0x4a   : > { %2017 = vmatprep.subr.bf16.mxu1 %v2316_v2  ;;  %s2331_s6 = smov 24  }
  0x4c   : > { %2014 = vmatmul.mubr.msk.bf16.vlgmr.msra.gmra.mrb[0].mxu1 %vm790_vm2, %v766_v5 }
  0x4d   : > { %2019 = vmatprep.mubr.msk.bf16.mxu1 %vm2317_vm1, %v2316_v2 }
 0x11f   : > { %v828_v7 = vpop.f32.mrb[0].mxu1 }
 0x120   : > { %v829_v8 = vadd.f32 %v1933_v6, %v828_v7  ;;  %v2015_v9 = vpop.f32.mrb[1].mxu1 }
 0x121   : > { %v831_v10 = vpop.f32.mrb[2].mxu1 }
 0x122   : > { %v836_v11 = vmul.f32 1.442695, %v829_v8  ;;  %v2016_v12 = vpop.f32.mrb[3].mxu1  ;;  %v835_v13 = vadd.f32 1.0, %v829_v8  ;;  %vm834_vm3 = vcmp.gt.f32.partialorder %v829_v8, 0.0  ;;  %v840_v17 = vpack.c.bf16 %v829_v8, %v829_v8 }
 0x124   : > { %2200 = vpow2.f32 %v836_v11 }
 0x12e   : > { %v2201_v14 = vpop.eup %2200 }
 0x12f   : > { %v838_v15 = vsel %vm834_vm3, %v835_v13, %v2201_v14  ;;  %v2190_v14 = vld [vmem:[%s2515_s12] sm:$0xff]  }
 0x130   : > { %v839_v16 = vpack.c.bf16 %v838_v15, %v838_v15 }
 0x132   : > { %949 = vrot.lane.b32.xlu1 %v839_v16, %s2318_s24  ;;  %842 = vrot.lane.b32.xlu0 %v839_v16, %s2319_s25  ;;  %s2845_s24 = scalar_lea.vmem %s2782_s5, %s2494_s19  ;;  %s2846_s25 = scalar_lea.vmem %s2784_s7, %s2494_s19 }
 0x136   : > { %1057 = vrot.lane.b32.xlu1 %v839_v16, %s2320_s26  ;;  %951 = vrot.lane.b32.xlu0 %v839_v16, %s2321_s28 }
 0x13a   : > { %1163 = vrot.lane.b32.xlu1 %v839_v16, %s2322_s27  ;;  %1055 = vrot.lane.b32.xlu0 %v839_v16, %s2323_s17 }
 0x13e   : > { %894 = vrot.lane.b32.xlu1 %v840_v17, %s2324_s30  ;;  %1161 = vrot.lane.b32.xlu0 %v839_v16, %s2325_s18 }
 0x142   : > { %1107 = vrot.lane.b32.xlu1 %v840_v17, %s2326_s14  ;;  %1001 = vrot.lane.b32.xlu0 %v840_v17, %s2327_s15 }
 0x146   : > { %1213 = vrot.lane.b32.xlu0 %v840_v17, %s2328_s13 }
 0x1a4   : > { %v950_v18 = vpop.permute.xlu1 %949  ;;  %v843_v19 = vpop.permute.xlu0 %842 }
 0x1a5   : > { %v849_v20 = vsel %vm844_vm4, %v843_v19, 0 }
 0x1a6   : > { %2018 = vmatpush3.bf16.xpose.msra.mxu1 %v849_v20 }
 0x1a7   : > { %2029 = vmatprep.subr.bf16.mxu1 %v2316_v2 }
 0x1a8   : > { %v1058_v21 = vpop.permute.xlu1 %1057  ;;  %v952_v22 = vpop.permute.xlu0 %951 }
 0x1a9   : > { %v957_v24 = vsel %vm844_vm4, %v952_v22, 0  ;;  %v1063_v27 = vsel %vm844_vm4, %v1058_v21, 0 }
 0x1ac   : > { %v1164_v23 = vpop.permute.xlu1 %1163  ;;  %v1056_v28 = vpop.permute.xlu0 %1055 }
 0x1ad   : > { %2020 = vmatmul.mubr.msk.bf16.vlgmr.msra.gmra.mrb[4].mxu1 %vm844_vm4, %v839_v16  ;;  %v1169_v29 = vsel %vm844_vm4, %v1164_v23, 0  ;;  %v2191_v23 = vld [vmem:[%s2515_s12 + $0x8] sm:$0xff]  }
 0x1ae   : > { %2030 = vmatpush3.bf16.xpose.msra.mxu1 %v957_v24  ;;  %2031 = vmatprep.mubr.msk.bf16.mxu1 %vm2317_vm1, %v2316_v2 }
 0x1af   : > { %2041 = vmatprep.subr.bf16.mxu1 %v2316_v2 }
 0x1b0   : > { %v895_v25 = vpop.permute.xlu1 %894  ;;  %v1162_v30 = vpop.permute.xlu0 %1161 }
 0x1b1   : > { %v901_v26 = vsel %vm899_vm5, %v895_v25, 0 }
 0x1b2   : > { %2024 = vmatpush3.bf16.msra.mxu0 %v901_v26 }
 0x1b3   : > { %2035 = vmatprep.subr.bf16.mxu0 %v2316_v2 }
 0x1b4   : > { %v1002_v35 = vpop.permute.xlu0 %1001  ;;  %v1108_v43 = vpop.permute.xlu1 %1107 }
 0x1b5   : > { %2032 = vmatmul.mubr.msk.bf16.vlgmr.msra.gmra.mrb[8].mxu1 %vm844_vm4, %v950_v18  ;;  %v1007_v41 = vsel %vm899_vm5, %v1002_v35, 0  ;;  %v1113_v50 = vsel %vm899_vm5, %v1108_v43, 0 }
 0x1b6   : > { %2042 = vmatpush3.bf16.xpose.msra.mxu1 %v1063_v27  ;;  %2043 = vmatprep.mubr.msk.bf16.mxu1 %vm2317_vm1, %v2316_v2 }
 0x1b7   : > { %2053 = vmatprep.subr.bf16.mxu1 %v2316_v2 }
 0x1b8   : > { %v1214_v53 = vpop.permute.xlu0 %1213 }
 0x1b9   : > { %v1219_v60 = vsel %vm899_vm5, %v1214_v53, 0 }
 0x1bd   : > { %2044 = vmatmul.mubr.msk.bf16.vlgmr.msra.gmra.mrb[12].mxu1 %vm844_vm4, %v1056_v28 }
 0x1be   : > { %2054 = vmatpush3.bf16.xpose.msra.mxu1 %v1169_v29  ;;  %2055 = vmatprep.mubr.msk.bf16.mxu1 %vm2317_vm1, %v2316_v2 }
 0x1bf   : > { %2065 = vmatprep.subr.bf16.mxu1 %v2316_v2 }
 0x1c5   : > { %2056 = vmatmul.mubr.msk.bf16.vlgmr.msra.gmra.mrb[16].mxu1 %vm844_vm4, %v1162_v30 }
 0x1c6   : > { %2069 = vmatprep.mubr.msk.bf16.mxu1 %vm2317_vm1, %v2316_v2  ;;  %2066 = vmatpush3.bf16.msra.mxu1 %v2190_v14  ;;  %v1949_v14 = vld [vmem:[%s2846_s25] ss:$0 sm:$0xff] }
 0x1c7   : > { %2067 = vmatprep.subr.bf16.mxu1 %v2316_v2 }
 0x1ca   : > { %2068 = vmatpush3.bf16.msra.mxu1 %v2191_v23 }
 0x1cb   : > { %2081 = vmatprep.subr.bf16.mxu1 %v2316_v2 }
 0x280   : > { %v885_v34 = vpop.f32.mrb[4].mxu1 }
 0x281   : > { %v891_v36 = vsel %vm765_vm6, %v885_v34, 0.0  ;;  %v2021_v37 = vpop.f32.mrb[5].mxu1 }
 0x282   : > { %v892_v38 = vpack.c.bf16 %v891_v36, %v891_v36  ;;  %v888_v39 = vpop.f32.mrb[6].mxu1  ;;  %v943_v51 = vsel %vm844_vm4, %v891_v36, 0.0 }
 0x283   : > { %v2022_v40 = vpop.f32.mrb[7].mxu1 }
 0x284   : > { %2026 = vmatmul.mubr.msk.bf16.vlgmr.msra.gmra.mrb[0].mxu0 %vm844_vm4, %v892_v38 }
 0x285   : > { %2036 = vmatpush3.bf16.msra.mxu0 %v1007_v41  ;;  %2037 = vmatprep.mubr.msk.bf16.mxu0 %vm2317_vm1, %v2316_v2 }
 0x286   : > { %2047 = vmatprep.subr.bf16.mxu0 %v2316_v2 }
 0x288   : > { %v993_v42 = vpop.f32.mrb[8].mxu1 }
 0x289   : > { %v999_v44 = vsel %vm765_vm6, %v993_v42, 0.0  ;;  %v2033_v45 = vpop.f32.mrb[9].mxu1 }
 0x28a   : > { %v1000_v46 = vpack.c.bf16 %v999_v44, %v999_v44  ;;  %v996_v47 = vpop.f32.mrb[10].mxu1  ;;  %v1049_v48 = vsel %vm844_vm4, %v999_v44, 0.0 }
 0x28b   : > { %1050 = vadd.xlane.f32.xlu1 %v1049_v48  ;;  %v2034_v49 = vpop.f32.mrb[11].mxu1  ;;  %v2192_v48 = vld [vmem:[%s2524_s20] sm:$0xff]  }
 0x28c   : > { %2038 = vmatmul.mubr.msk.bf16.vlgmr.msra.gmra.mrb[4].mxu0 %vm844_vm4, %v1000_v46  ;;  %v2193_v49 = vld [vmem:[%s2524_s20 + $0x8] sm:$0xff]  }
 0x28d   : > { %2048 = vmatpush3.bf16.msra.mxu0 %v1113_v50  ;;  %2049 = vmatprep.mubr.msk.bf16.mxu0 %vm2317_vm1, %v2316_v2  ;;  %v1376_v50 = vld [vmem:[%s2499_s0] sm:$0xff] }
 0x28e   : > { %2059 = vmatprep.subr.bf16.mxu0 %v2316_v2 }
 0x28f   : > { %944 = vadd.xlane.f32.xlu1 %v943_v51  ;;  %v1377_v51 = vpack.c.bf16 %v1376_v50, %v1376_v50 }
 0x290   : > { %v1099_v52 = vpop.f32.mrb[12].mxu1 }
 0x291   : > { %v1105_v54 = vsel %vm765_vm6, %v1099_v52, 0.0  ;;  %v2045_v55 = vpop.f32.mrb[13].mxu1  ;;  %v1945_v52 = vld [vmem:[%s2845_s24] ss:$0 sm:$0xff] }
 0x292   : > { %v1106_v56 = vpack.c.bf16 %v1105_v54, %v1105_v54  ;;  %v1102_v57 = vpop.f32.mrb[14].mxu1  ;;  %v1155_v58 = vsel %vm844_vm4, %v1105_v54, 0.0 }
 0x293   : > { %1156 = vadd.xlane.f32.xlu0 %v1155_v58  ;;  %v2046_v59 = vpop.f32.mrb[15].mxu1 }
 0x294   : > { %2050 = vmatmul.mubr.msk.bf16.vlgmr.msra.gmra.mrb[8].mxu0 %vm844_vm4, %v1106_v56 }
 0x295   : > { %2060 = vmatpush3.bf16.msra.mxu0 %v1219_v60  ;;  %2061 = vmatprep.mubr.msk.bf16.mxu0 %vm2317_vm1, %v2316_v2 }
 0x296   : > { %2073 = vmatprep.subr.bf16.mxu0 %v2316_v2 }
 0x298   : > { %v1205_v61 = vpop.f32.mrb[16].mxu1 }
 0x299   : > { %v1211_v62 = vsel %vm765_vm6, %v1205_v61, 0.0  ;;  %v2057_v63 = vpop.f32.mrb[17].mxu1 }
 0x29a   : > { %v1212_v0 = vpack.c.bf16 %v1211_v62, %v1211_v62  ;;  %v1208_v1 = vpop.f32.mrb[18].mxu1  ;;  %v1261_v3 = vsel %vm844_vm4, %v1211_v62, 0.0 }
 0x29b   : > { %1262 = vadd.xlane.f32.xlu0 %v1261_v3  ;;  %v2058_v5 = vpop.f32.mrb[19].mxu1 }
 0x29c   : > { %2062 = vmatmul.mubr.msk.bf16.vlgmr.msra.gmra.mrb[12].mxu0 %vm844_vm4, %v1212_v0 }
 0x29d   : > { %2077 = vmatprep.mubr.msk.bf16.mxu0 %vm2317_vm1, %v2316_v2  ;;  %2074 = vmatpush3.bf16.msra.mxu0 %v2192_v48 }
 0x29e   : > { %2075 = vmatprep.subr.bf16.mxu0 %v2316_v2 }
 0x2a1   : > { %2076 = vmatpush3.bf16.msra.mxu0 %v2193_v49 }
 0x2a2   : > { %2089 = vmatprep.subr.bf16.mxu0 %v2316_v2 }
 0x2a4   : > { %2078 = vmatmul.mubr.msk.bf16.vlgmr.msra.gmra.mrb[16].mxu0 %vm790_vm2, %v1377_v51 }
 0x2a5   : > { %2097 = vmatprep.mubr.msk.bf16.mxu0 %vm2317_vm1, %v2316_v2 }
 0x318   : > { %v1051_v6 = vpop.xlane.xlu1 %1050 }
 0x319   : > { %v1052_v7 = vadd.f32 1e-06, %v1051_v6 }
 0x31b   : > { %2202 = vrcp.f32 %v1052_v7 }
 0x31c   : > { %v945_v37 = vpop.xlane.xlu1 %944 }
 0x31d   : > { %v946_v38 = vadd.f32 1e-06, %v945_v37 }
 0x320   : > { %v1157_v8 = vpop.xlane.xlu0 %1156 }
 0x321   : > { %v1158_v11 = vadd.f32 1e-06, %v1157_v8 }
 0x323   : > { %2204 = vrcp.f32 %v1158_v11  ;;  %v2669_v11 = vld [vmem:[%s2558_s21] sm:$0x7]  ;;  %s2847_s21 = scalar_lea.vmem %s2786_s9, %s2494_s19  ;;  %s2848_s19 = sld [smem:[#allocation8_spill]] }
 0x325   : > { %v2203_v16 = vpop.eup %2202 }
 0x328   : > { %v1263_v15 = vpop.xlane.xlu0 %1262 }
 0x329   : > { %v1264_v20 = vadd.f32 1e-06, %v1263_v15  ;;  %p1963_p1 = scmp.ge.s32.totalorder %s2848_s19, 1 }
 0x32b   : > { %2206 = vrcp.f32 %v1264_v20 }
 0x32c   : > { %2208 = vrcp.f32 %v946_v38 }
 0x32d   : > { %v2205_v24 = vpop.eup %2204 }
 0x335   : > { %v2207_v30 = vpop.eup %2206 }
 0x336   : > { %v2209_v39 = vpop.eup %2208 }
 0x357   : > { %v937_v9 = vpop.f32.mrb[0].mxu0 }
 0x358   : > { %v2027_v10 = vpop.f32.mrb[1].mxu0  ;;  %v948_v42 = vmul.f32 %v2209_v39, %v937_v9  ;;  %v1368_v9 = vsub.s32 0, %v2607_v32 }
 0x359   : > { %v940_v12 = vpop.f32.mrb[2].mxu0  ;;  %v2666_v10 = vld [vmem:[%s2553_s16] sm:$0x7] }
 0x35a   : > { %v2028_v13 = vpop.f32.mrb[3].mxu0  ;;  %v1369_v12 = vrot.slane %v2666_v10, %v1368_v9 }
 0x35f   : > { %v1043_v17 = vpop.f32.mrb[4].mxu0 }
 0x360   : > { %v1054_v18 = vmul.f32 %v2203_v16, %v1043_v17  ;;  %v2039_v19 = vpop.f32.mrb[5].mxu0  ;;  %v1374_v16 = vrot.slane %v2669_v11, %v1368_v9  ;;  %v1640_v9 = vsub.s32 2, %v2607_v32 }
 0x361   : > { %v1046_v21 = vpop.f32.mrb[6].mxu0 }
 0x362   : > { %v2040_v22 = vpop.f32.mrb[7].mxu0  ;;  %1268 = vrot.lane.b32.xlu0 %v1054_v18, %s2329_s29 }
 0x367   : > { %v1149_v25 = vpop.f32.mrb[8].mxu0 }
 0x368   : > { %v1160_v26 = vmul.f32 %v2205_v24, %v1149_v25  ;;  %v2051_v27 = vpop.f32.mrb[9].mxu0 }
 0x369   : > { %v1152_v28 = vpop.f32.mrb[10].mxu0  ;;  %v2194_v27 = vld [vmem:[%s2533_s1] sm:$0xff]  }
 0x36a   : > { %1272 = vrot.lane.b32.xlu1 %v1160_v26, %s2330_s4  ;;  %v2052_v29 = vpop.f32.mrb[11].mxu0  ;;  %v2195_v28 = vld [vmem:[%s2533_s1 + $0x8] sm:$0xff]  }
 0x36f   : > { %v1255_v31 = vpop.f32.mrb[12].mxu0 }
 0x370   : > { %v1266_v33 = vmul.f32 %v2207_v30, %v1255_v31  ;;  %v2063_v34 = vpop.f32.mrb[13].mxu0 }
 0x371   : > { %v1258_v35 = vpop.f32.mrb[14].mxu0 }
 0x372   : > { %1276 = vrot.lane.b32.xlu1 %v1266_v33, %s2331_s6  ;;  %v2064_v36 = vpop.f32.mrb[15].mxu0  ;;  %v1460_v33 = vsub.s32 1, %v2607_v32 }
 0x374   : > { %v1461_v34 = vrot.slane %v2666_v10, %v1460_v33  ;;  %v1466_v36 = vrot.slane %v2669_v11, %v1460_v33 }
 0x377   : > { %v1438_v1 = vpop.f32.mrb[16].mxu0 }
 0x378   : > { %v2079_v3 = vpop.f32.mrb[17].mxu0  ;;  %v1439_v17 = vadd.f32 %v1949_v14, %v1438_v1  ;;  %v1646_v14 = vrot.slane %v2669_v11, %v1640_v9 }
 0x379   : > { %v1441_v5 = vpop.f32.mrb[18].mxu0 }
 0x37a   : > { %v2080_v6 = vpop.f32.mrb[19].mxu0 }
 0x3d4   : > { %v1269_v40 = vpop.permute.xlu0 %1268 }
 0x3d5   : > { %v1279_v43 = vsel %vm844_vm4, %v948_v42, %v1269_v40  ;;  %v2197_v42 = vld [vmem:[%s2543_s23 + $0x8] sm:$0xff]  }
 0x3dc   : > { %v1273_v41 = vpop.permute.xlu1 %1272 }
 0x3dd   : > { %v1281_v44 = vsel %vm1280_vm7, %v1279_v43, %v1273_v41  ;;  %v2196_v41 = vld [vmem:[%s2543_s23] sm:$0xff]   ;;  %v2198_v43 = vld [vmem:[%s2543_s23 + $0x10] sm:$0xff]  }
 0x3de   : > { %2090 = vmatpush3.bf16.msra.mxu0 %v2196_v41 }
 0x3df   : > { %2091 = vmatprep.subr.bf16.mxu0 %v2316_v2 }
 0x3e2   : > { %2092 = vmatpush3.bf16.msra.mxu0 %v2197_v42 }
 0x3e3   : > { %2093 = vmatprep.subr.bf16.mxu0 %v2316_v2 }
 0x3e4   : > { %v1277_v45 = vpop.permute.xlu1 %1276 }
 0x3e5   : > { %v1283_v46 = vsel %vm1282_vm8, %v1281_v44, %v1277_v45  ;;  %v2199_v44 = vld [vmem:[%s2543_s23 + $0x18] sm:$0xff]   ;;  %v1953_v45 = vld [vmem:[%s2847_s21] ss:$0 sm:$0xff] }
 0x3e6   : > { %v1284_v47 = vpack.c.bf16 %v1283_v46, %v1283_v46  ;;  %2094 = vmatpush3.bf16.msra.mxu0 %v2198_v43 }
 0x3e7   : > { %2095 = vmatprep.subr.bf16.mxu0 %v2316_v2 }
 0x3e8   : > { %2070 = vmatmul.mubr.msk.bf16.vlgmr.msra.gmra.mrb[20].mxu1 %vm790_vm2, %v1284_v47 }
 0x3e9   : > { %2085 = vmatprep.mubr.msk.bf16.mxu1 %vm2317_vm1, %v2316_v2  ;;  %2082 = vmatpush3.bf16.msra.mxu1 %v2194_v27 }
 0x3ea   : > { %2083 = vmatprep.subr.bf16.mxu1 %v2316_v2  ;;  %2096 = vmatpush3.bf16.msra.mxu0 %v2199_v44 }
 0x3ed   : > { %2084 = vmatpush3.bf16.msra.mxu1 %v2195_v28 }
 0x4bb   : > { %v1345_v53 = vpop.f32.mrb[20].mxu1 }
 0x4bc   : > { %v1346_v54 = vadd.f32 %v1945_v52, %v1345_v53  ;;  %v2071_v55 = vpop.f32.mrb[21].mxu1 }
 0x4bd   : > { %v1348_v56 = vpop.f32.mrb[22].mxu1 }
 0x4be   : > { %v2072_v57 = vpop.f32.mrb[23].mxu1  ;;  %v1351_v58 = vadd.f32 %v1346_v54, %v2569_v4  ;;  %v1957_v56 = vld [vmem:[%s741_s22] ss:$0 sm:$0xff] }
 0x4c0   : > { %v1352_v59 = vsel %vm790_vm2, %v1351_v58, 0.0 }
 0x4c1   : > { %1353 = vadd.xlane.f32.xlu0 %v1352_v59 }
 0x54e   : > { %v1354_v60 = vpop.xlane.xlu0 %1353 }
 0x54f   : > { %v1356_v61 = vmul.f32 0.03125, %v1354_v60 }
 0x551   : > { %v1357_v62 = vsub.f32 %v1351_v58, %v1356_v61 }
 0x553   : > { %v1358_v63 = vmul.f32 %v1357_v62, %v1357_v62 }
 0x555   : > { %v1359_v0 = vsel %vm790_vm2, %v1358_v63, 0.0 }
 0x556   : > { %1360 = vadd.xlane.f32.xlu1 %v1359_v0 }
 0x5e3   : > { %v1361_v7 = vpop.xlane.xlu1 %1360 }
 0x5e4   : > { %v1362_v8 = vmul.f32 0.03125, %v1361_v7 }
 0x5e6   : > { %v1363_v4 = vadd.f32 1e-05, %v1362_v8 }
 0x5e8   : > { %2210 = vrsqrt.f32 %v1363_v4 }
 0x5f2   : > { %v2211_v13 = vpop.eup %2210 }
 0x5f3   : > { %v1365_v15 = vmul.f32 %v2211_v13, %v1357_v62 }
 0x5f5   : > { %v1370_v18 = vmul.f32 %v1369_v12, %v1365_v15  ;;  %v1641_v12 = vrot.slane %v2666_v10, %v1640_v9 }
 0x5f7   : > { %v1375_v19 = vadd.f32 %v1374_v16, %v1370_v18 }
 0x5f9   : > { %v1444_v20 = vadd.f32 %v1439_v17, %v1375_v19 }
 0x5fb   : > { %v1445_v21 = vsel %vm790_vm2, %v1444_v20, 0.0 }
 0x5fc   : > { %1446 = vadd.xlane.f32.xlu0 %v1445_v21 }
 0x689   : > { %v1447_v22 = vpop.xlane.xlu0 %1446 }
 0x68a   : > { %v1448_v23 = vmul.f32 0.03125, %v1447_v22 }
 0x68c   : > { %v1449_v24 = vsub.f32 %v1444_v20, %v1448_v23 }
 0x68e   : > { %v1450_v25 = vmul.f32 %v1449_v24, %v1449_v24 }
 0x690   : > { %v1451_v26 = vsel %vm790_vm2, %v1450_v25, 0.0 }
 0x691   : > { %1452 = vadd.xlane.f32.xlu0 %v1451_v26 }
 0x71e   : > { %v1453_v29 = vpop.xlane.xlu0 %1452 }
 0x71f   : > { %v1454_v30 = vmul.f32 0.03125, %v1453_v29 }
 0x721   : > { %v1455_v31 = vadd.f32 1e-05, %v1454_v30 }
 0x723   : > { %2212 = vrsqrt.f32 %v1455_v31 }
 0x72d   : > { %v2213_v35 = vpop.eup %2212 }
 0x72e   : > { %v1457_v37 = vmul.f32 %v2213_v35, %v1449_v24 }
 0x730   : > { %v1462_v38 = vmul.f32 %v1461_v34, %v1457_v37 }
 0x732   : > { %v1467_v39 = vadd.f32 %v1466_v36, %v1462_v38 }
 0x734   : > { %v1468_v40 = vpack.c.bf16 %v1467_v39, %v1467_v39 }
 0x736   : > { %2086 = vmatmul.mubr.msk.bf16.vlgmr.msra.gmra.mrb[24].mxu1 %vm790_vm2, %v1468_v40 }
 0x809   : > { %v1529_v46 = vpop.f32.mrb[24].mxu1 }
 0x80a   : > { %v1530_v47 = vadd.f32 %v1953_v45, %v1529_v46  ;;  %v2087_v48 = vpop.f32.mrb[25].mxu1 }
 0x80b   : > { %v1532_v49 = vpop.f32.mrb[26].mxu1 }
 0x80c   : > { %v1536_v50 = vmul.f32 0.70710677, %v1530_v47  ;;  %v2088_v51 = vpop.f32.mrb[27].mxu1  ;;  %v1535_v53 = vmul.f32 0.5, %v1530_v47 }
 0x80e   : > { %2214 = verf.f32 %v1536_v50 }
 0x818   : > { %v2215_v52 = vpop.eup %2214 }
 0x819   : > { %v1538_v54 = vadd.f32 1.0, %v2215_v52 }
 0x81b   : > { %v1539_v55 = vmul.f32 %v1538_v54, %v1535_v53 }
 0x81d   : > { %v1540_v2 = vpack.c.bf16 %v1539_v55, %v1539_v55 }
 0x81f   : > { %2098 = vmatmul.mubr.msk.bf16.vlgmr.msra.gmra.mrb[20].mxu0 %vm1580_vm9, %v1540_v2 }
 0x8f2   : > { %v1618_v57 = vpop.f32.mrb[20].mxu0 }
 0x8f3   : > { %v1619_v58 = vadd.f32 %v1957_v56, %v1618_v57  ;;  %v2099_v59 = vpop.f32.mrb[21].mxu0 }
 0x8f4   : > { %v1621_v60 = vpop.f32.mrb[22].mxu0 }
 0x8f5   : > { %v2100_v61 = vpop.f32.mrb[23].mxu0  ;;  %v1624_v62 = vadd.f32 %v1619_v58, %v1467_v39 }
 0x8f7   : > { %v1625_v63 = vsel %vm790_vm2, %v1624_v62, 0.0 }
 0x8f8   : > { %1626 = vadd.xlane.f32.xlu1 %v1625_v63 }
 0x985   : > { %v1627_v0 = vpop.xlane.xlu1 %1626 }
 0x986   : > { %v1628_v1 = vmul.f32 0.03125, %v1627_v0 }
 0x988   : > { %v1629_v3 = vsub.f32 %v1624_v62, %v1628_v1 }
 0x98a   : > { %v1630_v5 = vmul.f32 %v1629_v3, %v1629_v3 }
 0x98c   : > { %v1631_v6 = vsel %vm790_vm2, %v1630_v5, 0.0 }
 0x98d   : > { %1632 = vadd.xlane.f32.xlu0 %v1631_v6 }
 0xa1a   : > { %v1633_v7 = vpop.xlane.xlu0 %1632 }
 0xa1b   : > { %v1634_v8 = vmul.f32 0.03125, %v1633_v7 }
 0xa1d   : > { %v1635_v4 = vadd.f32 1e-05, %v1634_v8 }
 0xa1f   : > { %2216 = vrsqrt.f32 %v1635_v4 }
 0xa28   : > { %1651 = sbr.rel (%p1963_p1) target bundleno = 2609 (0xa31), region = 92 }
 0xa29   : > { %v2217_v13 = vpop.eup %2216 }
 0xa2a   : > { %v1637_v15 = vmul.f32 %v2217_v13, %v1629_v3 }
 0xa2c   : > { %v1642_v16 = vmul.f32 %v1641_v12, %v1637_v15 }
 0xa2e   : > { %v1647_v17 = vadd.f32 %v1646_v14, %v1642_v16 }
 0xa30   : > { %1652 = vst.msk [vmem:[%s2560_s2] sm:$0xff] %vm790_vm2, %v1647_v17 }
 0xa31 PF: > { %s2849_s22 = sld [smem:[#allocation8_spill]] }
 0xa37   : > { %p1964_p2 = scmp.ne.s32.totalorder %s2849_s22, 1 }
 0xa38   : > { %v1659_v32 = vsel (!%p1964_p2), %vm790_vm2, %v1647_v17, 0.0  ;;  %s2850_s17 = sld [smem:[#allocation26_spill]] (!%p1964_p2)  ;;  %s2851_s14 = sld [smem:[#allocation27_spill]] (!%p1964_p2) }
 0xa39   : > { %1656 = sbr.rel (%p1964_p2) target bundleno = 2930 (0xb72), region = 96  ;;  %1660 = vadd.xlane.f32.xlu0 (!%p1964_p2), %v1659_v32 }
 0xa3e   : > { %v1965_v25 = vld [vmem:[%s2850_s17] ss:$0 sm:$0xff] (!%p1964_p2) }
 0xa3f   : > { %v1966_v27 = vld [vmem:[%s2851_s14] ss:$0 sm:$0xff] (!%p1964_p2) }
 0xac6   : > { %v1661_v10 = vpop.xlane.xlu0 %1660 }
 0xac7   : > { %v1662_v18 = vmul.f32 0.03125, %v1661_v10 }
 0xac9   : > { %v1663_v11 = vsub.f32 %v1647_v17, %v1662_v18 }
 0xacb   : > { %v1664_v19 = vmul.f32 %v1663_v11, %v1663_v11 }
 0xacd   : > { %v1665_v20 = vsel %vm790_vm2, %v1664_v19, 0.0 }
 0xace   : > { %1666 = vadd.xlane.f32.xlu0 %v1665_v20 }
 0xb5b   : > { %v1667_v21 = vpop.xlane.xlu0 %1666 }
 0xb5c   : > { %v1668_v22 = vmul.f32 0.03125, %v1667_v21 }
 0xb5e   : > { %v1669_v23 = vadd.f32 1e-05, %v1668_v22 }
 0xb60   : > { %2218 = vrsqrt.f32 %v1669_v23 }
 0xb6a   : > { %v2219_v24 = vpop.eup %2218 }
 0xb6b   : > { %v1671_v26 = vmul.f32 %v2219_v24, %v1663_v11 }
 0xb6d   : > { %v1678_v28 = vmul.f32 %v1965_v25, %v1671_v26 }
 0xb6f   : > { %v1685_v29 = vadd.f32 %v1966_v27, %v1678_v28 }
 0xb71   : > { %1686 = vst.msk [vmem:[%s2560_s2] sm:$0xff] %vm790_vm2, %v1685_v29 }
 0xb72 PF: > { %s2852_s15 = sld [smem:[#allocation9_spill]]  ;;  %s2853_s13 = sld [smem:[#allocation6_spill]] }
 0xb73   : > { %s2855_s8 = sld [smem:[#allocation28_spill]]  ;;  %s1701_s0 = sshll.u32 %s2560_s2, 4  ;;  %s1702_s0 = int_to_ptr.vmem [resolvable:$true] %s1701_s0 }
 0xb74   : > { %s2220_s1 = scalar_lea.vmem %s1702_s0, 128  ;;  %s2332_s16 = smov [#allocation2]  }
 0xb75   : > { %p2221_p4 = scmp.ne.s32.totalorder %s1702_s0, %s2220_s1  ;;  %s2224_s21 = sshll.u32 %s2332_s16, 4  ;;  %s2225_s21 = int_to_ptr.vmem [resolvable:$false] %s2224_s21 }
 0xb76   : > { %s2226_s23 = scalar_lea.vmem %s2225_s21, 256  ;;  %p2227_p7 = scmp.lt.s32.totalorder %s1702_s0, %s2225_s21 }
 0xb77   : > { %p2222_p5 = pnand %p2221_p4, %p2467_p3  ;;  %p2228_p8 = scmp.lt.s32.totalorder %s2226_s23, %s2220_s1 }
 0xb78   : > { %s1968_s4 = sshll.u32 %s2852_s15, 7  ;;  %s2856_s20 = sand.u32 1, %s2853_s13  }
 0xb79   : > { %s2727_s24 = scalar_lea.hbm %s2855_s8, %s1968_s4  ;;  %s1688_s25 = scalar_lea.sflag [#allocation3], %s2856_s20 }
 0xb7a   : > { %p2223_p6 = pneg %p2222_p5  ;;  %p2229_p10 = por %p2228_p8, %p2227_p7 }
 0xb7c   : > { %p2230_p11 = pnand %p2229_p10, %p2223_p6 }
 0xb7e   : > { %2233 = shalt.err (!%p2230_p11)
}
 0xb7f   : > { %s2234_s2 = scalar_lea.hbm %s2727_s24, 128  ;;  %s2238_s22 = scalar_lea.hbm %s2855_s8, 256 }
 0xb80   : > { %p2235_p12 = scmp.ne.s32.totalorder %s2727_s24, %s2234_s2  ;;  %p2239_p1 = scmp.lt.u32.totalorder %s2727_s24, %s2855_s8 }
 0xb81   : > { %p2240_p2 = scmp.lt.u32.totalorder %s2238_s22, %s2234_s2  ;;  %p2242_p5 = scmp.lt.u32.totalorder %s2234_s2, %s2727_s24 }
 0xb82   : > { %p2236_p13 = pnand %p2235_p12, %p2467_p3 }
 0xb83   : > { %p2241_p4 = por %p2240_p2, %p2239_p1 }
 0xb84   : > { %p2237_p0 = pneg %p2236_p13 }
 0xb85   : > { %p2243_p6 = por %p2242_p5, %p2241_p4 }
 0xb87   : > { %p2244_p7 = pnand %p2243_p6, %p2237_p0 }
 0xb89   : > { %2247 = shalt.err (!%p2244_p7)
}
 0xb8a   : > { %2101 = dma.vmem_to_hbm [thread:$0]  (%p2467_p3), %s1702_s0, 128, %s2727_s24, %s1688_s25  }
 0xb8b PF: > { %s2857_s17 = sld [smem:[#allocation12_spill]]  ;;  %s2858_s30 = sld [smem:[#allocation5_spill]] }
 0xb91   : > { %p2107_p8 = scmp.ge.s32.totalorder %s2857_s17, 2  ;;  %s1713_s14 = sand.u32 1, %s2858_s30  }
 0xb92   : > { %s1714_s15 = scalar_lea.sflag [#allocation3], %s1713_s14 }
 0xb93   : > { %p2104_p10 = pnand %p2107_p8, %p2477_p9 }
 0xb95   : > { %2281 = dma.done.wait (!%p2104_p10), %s1714_s15, 128  }
 0xb96   : > { %2283 = vsyncadd (!%p2104_p10), %s1714_s15, 4294967168  ;;  %s29_s28 = sadd.s32 1, %s2857_s17   ;;  %s2860_s21 = sld [smem:[#allocation6_spill]] }
 0xb97   : > { %p26_p11 = scmp.ge.s32.totalorder %s29_s28, 6   ;;  %s2861_s22 = sld [smem:[#allocation7_spill]] }
 0xb98   : > { %s2862_s23 = sld [smem:[#allocation17_spill]]  ;;  %s2863_s24 = sld [smem:[#allocation10_spill]] }
 0xb99   : > { %s2864_s25 = sld [smem:[#allocation11_spill]]  ;;  %s2865_s26 = sld [smem:[#allocation13_spill]] }
 0xb9a   : > { %s2866_s27 = sld [smem:[#allocation15_spill]]  ;;  %28 = sbr.rel (!%p26_p11) target bundleno = 17 (0x11), region = 170 }
 0xba1   :  { %1719 = vsyncpa [#allocation3], 1 }
 0xba2   :  { %1721 = vsyncpa [#allocation3 + $0x1], 1 }

</bundles_post_ra>
